<compile_context>
chip_gen: v7x
topology: tpu7x:2x2x1
jax: 0.10.0
libtpu: 0.0.40
codegen_flags: <defaults>
</compile_context>

<pallas_src>
import functools

import jax
import jax.numpy as jnp
import numpy as np
from jax.experimental import pallas as pl
from jax.experimental.pallas import tpu as pltpu

DISCOUNT = 0.99


def _multistep_loss_kernel(state_ref, actions_ref, targets_ref,
                           w1s_ref, w1a_ref, b1_ref,
                           w2_ref, b2_ref,
                           w3_ref, b3_ref,
                           out_ref, ha_ref, *, discount):
    """Whole rollout in one kernel invocation (everything resident in VMEM).

    Shapes (feature-last, step-major):
      state_ref   (B, S)
      actions_ref (T*B, A)   -- step-major: rows [t*B, (t+1)*B) belong to step t
      targets_ref (T, B, S)
      weights     (in_features, out_features), biases (1, out_features)
      out_ref     (1, 1) in SMEM
      ha_ref      (T, B, H) VMEM scratch (staged layer-1 action path + b1)
    """
    B, S = state_ref.shape
    T = targets_ref.shape[0]
    inv_n = 1.0 / float(B * S)          # MSELoss(mean) normalization per step

    # --- hoist / pre-cast all parameters out of the unrolled rollout loop ----
    b1 = b1_ref[...]
    b2 = b2_ref[...]
    b3 = b3_ref[...]
    w2_bf = w2_ref[...].astype(jnp.bfloat16)   # single-pass bf16 MXU operands
    w3_bf = w3_ref[...].astype(jnp.bfloat16)
    # State-path layer-1 rows, kept in f32 for the VPU FMA path.
    w1s = w1s_ref[...]
    w1s_rows = [w1s[j:j + 1, :] for j in range(S)]          # each (1, H)

    # --- action path of layer 1 for all T steps in ONE MXU matmul ------------
    # Independent of the autoregressive state -> off the serial critical path.
    # Bias folded in; staged step-major so the rollout loop only does a
    # leading-axis index (no per-step sublane extracts).
    ha_all = jnp.dot(actions_ref[...].astype(jnp.bfloat16),
                     w1a_ref[...].astype(jnp.bfloat16),
                     preferred_element_type=jnp.float32)    # (T*B, H)
    for i in range(T):
        ha_ref[i] = ha_all[i * B:(i + 1) * B, :] + b1       # (B, H)

    state = state_ref[...].astype(jnp.float32)
    acc = jnp.zeros((B, S), jnp.float32)   # vector accumulator (no per-step XLU)

    # Static unroll over rollout steps (T is small and compile-time constant).
    for i in range(T):
        # Layer 1: action path precomputed; state path (K=S tiny) as S broadcast
        # FMAs on the VPU instead of an MXU round trip on the critical path.
        h = ha_ref[i]                                        # (B, H)
        for j in range(S):
            h = h + state[:, j:j + 1] * w1s_rows[j]
        h = jnp.maximum(h, 0.0)

        # Layers 2/3: H-contraction on the MXU, bf16 operands, f32 accumulation.
        h = jnp.dot(h.astype(jnp.bfloat16), w2_bf,
                    preferred_element_type=jnp.float32) + b2
        h = jnp.maximum(h, 0.0)
        pred = jnp.dot(h.astype(jnp.bfloat16), w3_bf,
                       preferred_element_type=jnp.float32) + b3

        # Discounted squared error accumulated in (B, S); discount**i is a
        # compile-time constant folded into the FMA.
        diff = pred - targets_ref[i].astype(jnp.float32)
        acc = acc + (diff * diff) * (discount ** i)

        state = pred                        # autoregressive rollout

    # Single post-loop reduction; scalar written straight to SMEM.
    out_ref[0, 0] = jnp.sum(acc) * inv_n


def multi_step_loss(state, actions, target_states, params, discount=DISCOUNT):
    """params = (W1_s, W1_a, b1, W2, b2, W3, b3), feature-last layout.

    state: (B, S), actions: (B, T, A), target_states: (B, T, S).
    """
    B, S = state.shape
    _, T, A = actions.shape
    H = params[2].shape[1]

    # Step-major re-layout in plain JAX (outside the kernel):
    #   actions -> (T*B, A) so the layer-1 action path is one 2-D matmul,
    #   targets -> (T, B, S) so the kernel indexes only the leading axis.
    actions_sm = jnp.transpose(actions, (1, 0, 2)).reshape(T * B, A)
    targets_sm = jnp.transpose(target_states, (1, 0, 2))

    operands = (state, actions_sm, targets_sm) + tuple(params)

    # Explicit VMEM budget: everything resident (KB-scale here); capped at
    # 32 MiB so the request is valid on v7x's 64 MiB physical VMEM as well as
    # v5e/v6e's 128 MiB.
    in_bytes = sum(int(np.prod(a.shape)) * jnp.dtype(a.dtype).itemsize
                   for a in operands)
    vmem_limit = int(min(32 * 1024 * 1024,
                         max(4 * 1024 * 1024, 8 * in_bytes)))

    # Advisory cost estimate so XLA can overlap this tiny, latency-bound call.
    flops = 2 * T * B * (S * H + H * H + H * S) + 2 * T * B * A * H
    cost = pl.CostEstimate(flops=flops, transcendentals=0,
                           bytes_accessed=in_bytes + 4)

    vmem = pl.BlockSpec(memory_space=pltpu.MemorySpace.VMEM)
    smem_out = pl.BlockSpec(memory_space=pltpu.MemorySpace.SMEM)
    kernel = functools.partial(_multistep_loss_kernel, discount=discount)

    out = pl.pallas_call(
        kernel,
        out_shape=jax.ShapeDtypeStruct((1, 1), jnp.float32),
        in_specs=[vmem] * len(operands),
        out_specs=smem_out,
        scratch_shapes=[pltpu.VMEM((T, B, H), jnp.float32)],
        compiler_params=pltpu.CompilerParams(vmem_limit_bytes=vmem_limit),
        cost_estimate=cost,
    )(*operands)
    return out[0, 0]


def _reference(state, actions, target_states, params, discount=DISCOUNT):
    """Pure-JAX f32 reference reproducing the PyTorch forward exactly."""
    w1s, w1a, b1, w2, b2, w3, b3 = params
    total = 0.0
    T = actions.shape[1]
    for i in range(T):
        h = jnp.maximum(state @ w1s + actions[:, i, :] @ w1a + b1, 0.0)
        h = jnp.maximum(h @ w2 + b2, 0.0)
        pred = h @ w3 + b3
        total = total + jnp.mean((pred - target_states[:, i, :]) ** 2) * (discount ** i)
        state = pred
    return total


if __name__ == "__main__":
    B, T, S, A, H = 2, 8, 4, 3, 32

    key = jax.random.PRNGKey(0)
    ks = jax.random.split(key, 10)

    state = jax.random.normal(ks[0], (B, S), jnp.float32)
    actions = jax.random.normal(ks[1], (B, T, A), jnp.float32)
    target_states = jax.random.normal(ks[2], (B, T, S), jnp.float32)

    # Deterministic synthetic MLP parameters (not a checkpoint load).
    w1s = 0.1 * jax.random.normal(ks[3], (S, H), jnp.float32)
    w1a = 0.1 * jax.random.normal(ks[4], (A, H), jnp.float32)
    b1 = 0.1 * jax.random.normal(ks[5], (1, H), jnp.float32)
    w2 = 0.1 * jax.random.normal(ks[6], (H, H), jnp.float32)
    b2 = 0.1 * jax.random.normal(ks[7], (1, H), jnp.float32)
    w3 = 0.1 * jax.random.normal(ks[8], (H, S), jnp.float32)
    b3 = 0.1 * jax.random.normal(ks[9], (1, S), jnp.float32)
    params = (w1s, w1a, b1, w2, b2, w3, b3)

    loss = multi_step_loss(state, actions, target_states, params)
    jax.block_until_ready(loss)

    ref = _reference(state, actions, target_states, params)
    # Tolerance loosened because MXU dot operands are bf16 (f32 accumulation);
    # the fp32 reference differs by O(1e-3) relative at these shapes.
    np.testing.assert_allclose(np.asarray(loss), np.asarray(ref),
                               rtol=2e-2, atol=2e-2)

    print("KERNEL_OK")
</pallas_src>

<mosaic_0001>
module attributes {stable_mosaic.version = 11 : i64} {
  func.func @_multistep_loss_kernel(%arg0: memref<2x4xf32, #tpu.memory_space<vmem>>, %arg1: memref<16x3xf32, #tpu.memory_space<vmem>>, %arg2: memref<8x2x4xf32, #tpu.memory_space<vmem>>, %arg3: memref<4x32xf32, #tpu.memory_space<vmem>>, %arg4: memref<3x32xf32, #tpu.memory_space<vmem>>, %arg5: memref<1x32xf32, #tpu.memory_space<vmem>>, %arg6: memref<32x32xf32, #tpu.memory_space<vmem>>, %arg7: memref<1x32xf32, #tpu.memory_space<vmem>>, %arg8: memref<32x4xf32, #tpu.memory_space<vmem>>, %arg9: memref<1x4xf32, #tpu.memory_space<vmem>>, %arg10: memref<1x1xf32, #tpu.memory_space<smem>>, %arg11: memref<8x2x32xf32, #tpu.memory_space<vmem>>) attributes {dimension_semantics = [], scalar_prefetch = 0 : i64, scratch_operands = 1 : i64, tpu.core_type = #tpu.core_type<tc>} {
    %c0 = arith.constant 0 : index
    %c0_0 = arith.constant 0 : index
    %0 = vector.load %arg5[%c0, %c0_0] : memref<1x32xf32, #tpu.memory_space<vmem>>, vector<1x32xf32>
    %c0_1 = arith.constant 0 : index
    %c0_2 = arith.constant 0 : index
    %1 = vector.load %arg7[%c0_1, %c0_2] : memref<1x32xf32, #tpu.memory_space<vmem>>, vector<1x32xf32>
    %c0_3 = arith.constant 0 : index
    %c0_4 = arith.constant 0 : index
    %2 = vector.load %arg9[%c0_3, %c0_4] : memref<1x4xf32, #tpu.memory_space<vmem>>, vector<1x4xf32>
    %c0_5 = arith.constant 0 : index
    %c0_6 = arith.constant 0 : index
    %3 = vector.load %arg6[%c0_5, %c0_6] : memref<32x32xf32, #tpu.memory_space<vmem>>, vector<32x32xf32>
    %4 = arith.truncf %3 : vector<32x32xf32> to vector<32x32xbf16>
    %c0_7 = arith.constant 0 : index
    %c0_8 = arith.constant 0 : index
    %5 = vector.load %arg8[%c0_7, %c0_8] : memref<32x4xf32, #tpu.memory_space<vmem>>, vector<32x4xf32>
    %6 = arith.truncf %5 : vector<32x4xf32> to vector<32x4xbf16>
    %c0_9 = arith.constant 0 : index
    %c0_10 = arith.constant 0 : index
    %7 = vector.load %arg3[%c0_9, %c0_10] : memref<4x32xf32, #tpu.memory_space<vmem>>, vector<4x32xf32>
    %8 = vector.extract_strided_slice %7 {offsets = [0, 0], sizes = [1, 32], strides = [1, 1]} : vector<4x32xf32> to vector<1x32xf32>
    %9 = vector.extract_strided_slice %7 {offsets = [1, 0], sizes = [1, 32], strides = [1, 1]} : vector<4x32xf32> to vector<1x32xf32>
    %10 = vector.extract_strided_slice %7 {offsets = [2, 0], sizes = [1, 32], strides = [1, 1]} : vector<4x32xf32> to vector<1x32xf32>
    %11 = vector.extract_strided_slice %7 {offsets = [3, 0], sizes = [1, 32], strides = [1, 1]} : vector<4x32xf32> to vector<1x32xf32>
    %c0_11 = arith.constant 0 : index
    %c0_12 = arith.constant 0 : index
    %12 = vector.load %arg1[%c0_11, %c0_12] : memref<16x3xf32, #tpu.memory_space<vmem>>, vector<16x3xf32>
    %13 = arith.truncf %12 : vector<16x3xf32> to vector<16x3xbf16>
    %c0_13 = arith.constant 0 : index
    %c0_14 = arith.constant 0 : index
    %14 = vector.load %arg4[%c0_13, %c0_14] : memref<3x32xf32, #tpu.memory_space<vmem>>, vector<3x32xf32>
    %15 = arith.truncf %14 : vector<3x32xf32> to vector<3x32xbf16>
    %cst = arith.constant dense<0.000000e+00> : vector<16x32xf32>
    %16 = tpu.matmul %13, %15, %cst {dimension_numbers = #tpu.dot_dimension_numbers<[1], [0], [0], [1], [0, 0, 1, 1], [], []>} : vector<16x3xbf16>, vector<3x32xbf16>, vector<16x32xf32> -> vector<16x32xf32>
    %17 = vector.extract_strided_slice %16 {offsets = [0, 0], sizes = [2, 32], strides = [1, 1]} : vector<16x32xf32> to vector<2x32xf32>
    %18 = vector.broadcast %0 : vector<1x32xf32> to vector<2x32xf32>
    %19 = arith.addf %17, %18 : vector<2x32xf32>
    %c0_15 = arith.constant 0 : index
    %c0_16 = arith.constant 0 : index
    %c0_17 = arith.constant 0 : index
    %20 = vector.load %arg11[%c0_15, %c0_16, %c0_17] : memref<8x2x32xf32, #tpu.memory_space<vmem>>, vector<1x2x32xf32>
    %21 = vector.shape_cast %20 : vector<1x2x32xf32> to vector<2x32xf32>
    %22 = vector.shape_cast %19 : vector<2x32xf32> to vector<1x2x32xf32>
    tpu.vector_store %arg11[%c0_15, %c0_16, %c0_17], %22 {strides = array<i32>} : memref<8x2x32xf32, #tpu.memory_space<vmem>>, vector<1x2x32xf32>,
    %23 = vector.extract_strided_slice %16 {offsets = [2, 0], sizes = [2, 32], strides = [1, 1]} : vector<16x32xf32> to vector<2x32xf32>
    %24 = vector.broadcast %0 : vector<1x32xf32> to vector<2x32xf32>
    %25 = arith.addf %23, %24 : vector<2x32xf32>
    %c1 = arith.constant 1 : index
    %c0_18 = arith.constant 0 : index
    %c0_19 = arith.constant 0 : index
    %26 = vector.load %arg11[%c1, %c0_18, %c0_19] : memref<8x2x32xf32, #tpu.memory_space<vmem>>, vector<1x2x32xf32>
    %27 = vector.shape_cast %26 : vector<1x2x32xf32> to vector<2x32xf32>
    %28 = vector.shape_cast %25 : vector<2x32xf32> to vector<1x2x32xf32>
    tpu.vector_store %arg11[%c1, %c0_18, %c0_19], %28 {strides = array<i32>} : memref<8x2x32xf32, #tpu.memory_space<vmem>>, vector<1x2x32xf32>,
    %29 = vector.extract_strided_slice %16 {offsets = [4, 0], sizes = [2, 32], strides = [1, 1]} : vector<16x32xf32> to vector<2x32xf32>
    %30 = vector.broadcast %0 : vector<1x32xf32> to vector<2x32xf32>
    %31 = arith.addf %29, %30 : vector<2x32xf32>
    %c2 = arith.constant 2 : index
    %c0_20 = arith.constant 0 : index
    %c0_21 = arith.constant 0 : index
    %32 = vector.load %arg11[%c2, %c0_20, %c0_21] : memref<8x2x32xf32, #tpu.memory_space<vmem>>, vector<1x2x32xf32>
    %33 = vector.shape_cast %32 : vector<1x2x32xf32> to vector<2x32xf32>
    %34 = vector.shape_cast %31 : vector<2x32xf32> to vector<1x2x32xf32>
    tpu.vector_store %arg11[%c2, %c0_20, %c0_21], %34 {strides = array<i32>} : memref<8x2x32xf32, #tpu.memory_space<vmem>>, vector<1x2x32xf32>,
    %35 = vector.extract_strided_slice %16 {offsets = [6, 0], sizes = [2, 32], strides = [1, 1]} : vector<16x32xf32> to vector<2x32xf32>
    %36 = vector.broadcast %0 : vector<1x32xf32> to vector<2x32xf32>
    %37 = arith.addf %35, %36 : vector<2x32xf32>
    %c3 = arith.constant 3 : index
    %c0_22 = arith.constant 0 : index
    %c0_23 = arith.constant 0 : index
    %38 = vector.load %arg11[%c3, %c0_22, %c0_23] : memref<8x2x32xf32, #tpu.memory_space<vmem>>, vector<1x2x32xf32>
    %39 = vector.shape_cast %38 : vector<1x2x32xf32> to vector<2x32xf32>
    %40 = vector.shape_cast %37 : vector<2x32xf32> to vector<1x2x32xf32>
    tpu.vector_store %arg11[%c3, %c0_22, %c0_23], %40 {strides = array<i32>} : memref<8x2x32xf32, #tpu.memory_space<vmem>>, vector<1x2x32xf32>,
    %41 = vector.extract_strided_slice %16 {offsets = [8, 0], sizes = [2, 32], strides = [1, 1]} : vector<16x32xf32> to vector<2x32xf32>
    %42 = vector.broadcast %0 : vector<1x32xf32> to vector<2x32xf32>
    %43 = arith.addf %41, %42 : vector<2x32xf32>
    %c4 = arith.constant 4 : index
    %c0_24 = arith.constant 0 : index
    %c0_25 = arith.constant 0 : index
    %44 = vector.load %arg11[%c4, %c0_24, %c0_25] : memref<8x2x32xf32, #tpu.memory_space<vmem>>, vector<1x2x32xf32>
    %45 = vector.shape_cast %44 : vector<1x2x32xf32> to vector<2x32xf32>
    %46 = vector.shape_cast %43 : vector<2x32xf32> to vector<1x2x32xf32>
    tpu.vector_store %arg11[%c4, %c0_24, %c0_25], %46 {strides = array<i32>} : memref<8x2x32xf32, #tpu.memory_space<vmem>>, vector<1x2x32xf32>,
    %47 = vector.extract_strided_slice %16 {offsets = [10, 0], sizes = [2, 32], strides = [1, 1]} : vector<16x32xf32> to vector<2x32xf32>
    %48 = vector.broadcast %0 : vector<1x32xf32> to vector<2x32xf32>
    %49 = arith.addf %47, %48 : vector<2x32xf32>
    %c5 = arith.constant 5 : index
    %c0_26 = arith.constant 0 : index
    %c0_27 = arith.constant 0 : index
    %50 = vector.load %arg11[%c5, %c0_26, %c0_27] : memref<8x2x32xf32, #tpu.memory_space<vmem>>, vector<1x2x32xf32>
    %51 = vector.shape_cast %50 : vector<1x2x32xf32> to vector<2x32xf32>
    %52 = vector.shape_cast %49 : vector<2x32xf32> to vector<1x2x32xf32>
    tpu.vector_store %arg11[%c5, %c0_26, %c0_27], %52 {strides = array<i32>} : memref<8x2x32xf32, #tpu.memory_space<vmem>>, vector<1x2x32xf32>,
    %53 = vector.extract_strided_slice %16 {offsets = [12, 0], sizes = [2, 32], strides = [1, 1]} : vector<16x32xf32> to vector<2x32xf32>
    %54 = vector.broadcast %0 : vector<1x32xf32> to vector<2x32xf32>
    %55 = arith.addf %53, %54 : vector<2x32xf32>
    %c6 = arith.constant 6 : index
    %c0_28 = arith.constant 0 : index
    %c0_29 = arith.constant 0 : index
    %56 = vector.load %arg11[%c6, %c0_28, %c0_29] : memref<8x2x32xf32, #tpu.memory_space<vmem>>, vector<1x2x32xf32>
    %57 = vector.shape_cast %56 : vector<1x2x32xf32> to vector<2x32xf32>
    %58 = vector.shape_cast %55 : vector<2x32xf32> to vector<1x2x32xf32>
    tpu.vector_store %arg11[%c6, %c0_28, %c0_29], %58 {strides = array<i32>} : memref<8x2x32xf32, #tpu.memory_space<vmem>>, vector<1x2x32xf32>,
    %59 = vector.extract_strided_slice %16 {offsets = [14, 0], sizes = [2, 32], strides = [1, 1]} : vector<16x32xf32> to vector<2x32xf32>
    %60 = vector.broadcast %0 : vector<1x32xf32> to vector<2x32xf32>
    %61 = arith.addf %59, %60 : vector<2x32xf32>
    %c7 = arith.constant 7 : index
    %c0_30 = arith.constant 0 : index
    %c0_31 = arith.constant 0 : index
    %62 = vector.load %arg11[%c7, %c0_30, %c0_31] : memref<8x2x32xf32, #tpu.memory_space<vmem>>, vector<1x2x32xf32>
    %63 = vector.shape_cast %62 : vector<1x2x32xf32> to vector<2x32xf32>
    %64 = vector.shape_cast %61 : vector<2x32xf32> to vector<1x2x32xf32>
    tpu.vector_store %arg11[%c7, %c0_30, %c0_31], %64 {strides = array<i32>} : memref<8x2x32xf32, #tpu.memory_space<vmem>>, vector<1x2x32xf32>,
    %c0_32 = arith.constant 0 : index
    %c0_33 = arith.constant 0 : index
    %65 = vector.load %arg0[%c0_32, %c0_33] : memref<2x4xf32, #tpu.memory_space<vmem>>, vector<2x4xf32>
    %cst_34 = arith.constant 0.000000e+00 : f32
    %66 = vector.broadcast %cst_34 : f32 to vector<2x4xf32>
    %c0_35 = arith.constant 0 : index
    %c0_36 = arith.constant 0 : index
    %c0_37 = arith.constant 0 : index
    %67 = vector.load %arg11[%c0_35, %c0_36, %c0_37] : memref<8x2x32xf32, #tpu.memory_space<vmem>>, vector<1x2x32xf32>
    %68 = vector.shape_cast %67 : vector<1x2x32xf32> to vector<2x32xf32>
    %69 = vector.extract_strided_slice %65 {offsets = [0, 0], sizes = [2, 1], strides = [1, 1]} : vector<2x4xf32> to vector<2x1xf32>
    %70 = vector.broadcast %69 : vector<2x1xf32> to vector<2x32xf32>
    %71 = vector.broadcast %8 : vector<1x32xf32> to vector<2x32xf32>
    %72 = arith.mulf %70, %71 : vector<2x32xf32>
    %73 = arith.addf %68, %72 : vector<2x32xf32>
    %74 = vector.extract_strided_slice %65 {offsets = [0, 1], sizes = [2, 1], strides = [1, 1]} : vector<2x4xf32> to vector<2x1xf32>
    %75 = vector.broadcast %74 : vector<2x1xf32> to vector<2x32xf32>
    %76 = vector.broadcast %9 : vector<1x32xf32> to vector<2x32xf32>
    %77 = arith.mulf %75, %76 : vector<2x32xf32>
    %78 = arith.addf %73, %77 : vector<2x32xf32>
    %79 = vector.extract_strided_slice %65 {offsets = [0, 2], sizes = [2, 1], strides = [1, 1]} : vector<2x4xf32> to vector<2x1xf32>
    %80 = vector.broadcast %79 : vector<2x1xf32> to vector<2x32xf32>
    %81 = vector.broadcast %10 : vector<1x32xf32> to vector<2x32xf32>
    %82 = arith.mulf %80, %81 : vector<2x32xf32>
    %83 = arith.addf %78, %82 : vector<2x32xf32>
    %84 = vector.extract_strided_slice %65 {offsets = [0, 3], sizes = [2, 1], strides = [1, 1]} : vector<2x4xf32> to vector<2x1xf32>
    %85 = vector.broadcast %84 : vector<2x1xf32> to vector<2x32xf32>
    %86 = vector.broadcast %11 : vector<1x32xf32> to vector<2x32xf32>
    %87 = arith.mulf %85, %86 : vector<2x32xf32>
    %88 = arith.addf %83, %87 : vector<2x32xf32>
    %cst_38 = arith.constant 0.000000e+00 : f32
    %89 = vector.broadcast %cst_38 : f32 to vector<2x32xf32>
    %90 = arith.maximumf %88, %89 : vector<2x32xf32>
    %91 = arith.truncf %90 : vector<2x32xf32> to vector<2x32xbf16>
    %cst_39 = arith.constant dense<0.000000e+00> : vector<2x32xf32>
    %92 = tpu.matmul %91, %4, %cst_39 {dimension_numbers = #tpu.dot_dimension_numbers<[1], [0], [0], [1], [0, 0, 1, 1], [], []>} : vector<2x32xbf16>, vector<32x32xbf16>, vector<2x32xf32> -> vector<2x32xf32>
    %93 = vector.broadcast %1 : vector<1x32xf32> to vector<2x32xf32>
    %94 = arith.addf %92, %93 : vector<2x32xf32>
    %cst_40 = arith.constant 0.000000e+00 : f32
    %95 = vector.broadcast %cst_40 : f32 to vector<2x32xf32>
    %96 = arith.maximumf %94, %95 : vector<2x32xf32>
    %97 = arith.truncf %96 : vector<2x32xf32> to vector<2x32xbf16>
    %cst_41 = arith.constant dense<0.000000e+00> : vector<2x4xf32>
    %98 = tpu.matmul %97, %6, %cst_41 {dimension_numbers = #tpu.dot_dimension_numbers<[1], [0], [0], [1], [0, 0, 1, 1], [], []>} : vector<2x32xbf16>, vector<32x4xbf16>, vector<2x4xf32> -> vector<2x4xf32>
    %99 = vector.broadcast %2 : vector<1x4xf32> to vector<2x4xf32>
    %100 = arith.addf %98, %99 : vector<2x4xf32>
    %c0_42 = arith.constant 0 : index
    %c0_43 = arith.constant 0 : index
    %c0_44 = arith.constant 0 : index
    %101 = vector.load %arg2[%c0_42, %c0_43, %c0_44] : memref<8x2x4xf32, #tpu.memory_space<vmem>>, vector<1x2x4xf32>
    %102 = vector.shape_cast %101 : vector<1x2x4xf32> to vector<2x4xf32>
    %103 = arith.subf %100, %102 : vector<2x4xf32>
    %104 = arith.mulf %103, %103 : vector<2x4xf32>
    %cst_45 = arith.constant 1.000000e+00 : f32
    %105 = vector.broadcast %cst_45 : f32 to vector<2x4xf32>
    %106 = arith.mulf %104, %105 : vector<2x4xf32>
    %107 = arith.addf %66, %106 : vector<2x4xf32>
    %c1_46 = arith.constant 1 : index
    %c0_47 = arith.constant 0 : index
    %c0_48 = arith.constant 0 : index
    %108 = vector.load %arg11[%c1_46, %c0_47, %c0_48] : memref<8x2x32xf32, #tpu.memory_space<vmem>>, vector<1x2x32xf32>
    %109 = vector.shape_cast %108 : vector<1x2x32xf32> to vector<2x32xf32>
    %110 = vector.extract_strided_slice %100 {offsets = [0, 0], sizes = [2, 1], strides = [1, 1]} : vector<2x4xf32> to vector<2x1xf32>
    %111 = vector.broadcast %110 : vector<2x1xf32> to vector<2x32xf32>
    %112 = vector.broadcast %8 : vector<1x32xf32> to vector<2x32xf32>
    %113 = arith.mulf %111, %112 : vector<2x32xf32>
    %114 = arith.addf %109, %113 : vector<2x32xf32>
    %115 = vector.extract_strided_slice %100 {offsets = [0, 1], sizes = [2, 1], strides = [1, 1]} : vector<2x4xf32> to vector<2x1xf32>
    %116 = vector.broadcast %115 : vector<2x1xf32> to vector<2x32xf32>
    %117 = vector.broadcast %9 : vector<1x32xf32> to vector<2x32xf32>
    %118 = arith.mulf %116, %117 : vector<2x32xf32>
    %119 = arith.addf %114, %118 : vector<2x32xf32>
    %120 = vector.extract_strided_slice %100 {offsets = [0, 2], sizes = [2, 1], strides = [1, 1]} : vector<2x4xf32> to vector<2x1xf32>
    %121 = vector.broadcast %120 : vector<2x1xf32> to vector<2x32xf32>
    %122 = vector.broadcast %10 : vector<1x32xf32> to vector<2x32xf32>
    %123 = arith.mulf %121, %122 : vector<2x32xf32>
    %124 = arith.addf %119, %123 : vector<2x32xf32>
    %125 = vector.extract_strided_slice %100 {offsets = [0, 3], sizes = [2, 1], strides = [1, 1]} : vector<2x4xf32> to vector<2x1xf32>
    %126 = vector.broadcast %125 : vector<2x1xf32> to vector<2x32xf32>
    %127 = vector.broadcast %11 : vector<1x32xf32> to vector<2x32xf32>
    %128 = arith.mulf %126, %127 : vector<2x32xf32>
    %129 = arith.addf %124, %128 : vector<2x32xf32>
    %cst_49 = arith.constant 0.000000e+00 : f32
    %130 = vector.broadcast %cst_49 : f32 to vector<2x32xf32>
    %131 = arith.maximumf %129, %130 : vector<2x32xf32>
    %132 = arith.truncf %131 : vector<2x32xf32> to vector<2x32xbf16>
    %cst_50 = arith.constant dense<0.000000e+00> : vector<2x32xf32>
    %133 = tpu.matmul %132, %4, %cst_50 {dimension_numbers = #tpu.dot_dimension_numbers<[1], [0], [0], [1], [0, 0, 1, 1], [], []>} : vector<2x32xbf16>, vector<32x32xbf16>, vector<2x32xf32> -> vector<2x32xf32>
    %134 = vector.broadcast %1 : vector<1x32xf32> to vector<2x32xf32>
    %135 = arith.addf %133, %134 : vector<2x32xf32>
    %cst_51 = arith.constant 0.000000e+00 : f32
    %136 = vector.broadcast %cst_51 : f32 to vector<2x32xf32>
    %137 = arith.maximumf %135, %136 : vector<2x32xf32>
    %138 = arith.truncf %137 : vector<2x32xf32> to vector<2x32xbf16>
    %cst_52 = arith.constant dense<0.000000e+00> : vector<2x4xf32>
    %139 = tpu.matmul %138, %6, %cst_52 {dimension_numbers = #tpu.dot_dimension_numbers<[1], [0], [0], [1], [0, 0, 1, 1], [], []>} : vector<2x32xbf16>, vector<32x4xbf16>, vector<2x4xf32> -> vector<2x4xf32>
    %140 = vector.broadcast %2 : vector<1x4xf32> to vector<2x4xf32>
    %141 = arith.addf %139, %140 : vector<2x4xf32>
    %c1_53 = arith.constant 1 : index
    %c0_54 = arith.constant 0 : index
    %c0_55 = arith.constant 0 : index
    %142 = vector.load %arg2[%c1_53, %c0_54, %c0_55] : memref<8x2x4xf32, #tpu.memory_space<vmem>>, vector<1x2x4xf32>
    %143 = vector.shape_cast %142 : vector<1x2x4xf32> to vector<2x4xf32>
    %144 = arith.subf %141, %143 : vector<2x4xf32>
    %145 = arith.mulf %144, %144 : vector<2x4xf32>
    %cst_56 = arith.constant 9.900000e-01 : f32
    %146 = vector.broadcast %cst_56 : f32 to vector<2x4xf32>
    %147 = arith.mulf %145, %146 : vector<2x4xf32>
    %148 = arith.addf %107, %147 : vector<2x4xf32>
    %c2_57 = arith.constant 2 : index
    %c0_58 = arith.constant 0 : index
    %c0_59 = arith.constant 0 : index
    %149 = vector.load %arg11[%c2_57, %c0_58, %c0_59] : memref<8x2x32xf32, #tpu.memory_space<vmem>>, vector<1x2x32xf32>
    %150 = vector.shape_cast %149 : vector<1x2x32xf32> to vector<2x32xf32>
    %151 = vector.extract_strided_slice %141 {offsets = [0, 0], sizes = [2, 1], strides = [1, 1]} : vector<2x4xf32> to vector<2x1xf32>
    %152 = vector.broadcast %151 : vector<2x1xf32> to vector<2x32xf32>
    %153 = vector.broadcast %8 : vector<1x32xf32> to vector<2x32xf32>
    %154 = arith.mulf %152, %153 : vector<2x32xf32>
    %155 = arith.addf %150, %154 : vector<2x32xf32>
    %156 = vector.extract_strided_slice %141 {offsets = [0, 1], sizes = [2, 1], strides = [1, 1]} : vector<2x4xf32> to vector<2x1xf32>
    %157 = vector.broadcast %156 : vector<2x1xf32> to vector<2x32xf32>
    %158 = vector.broadcast %9 : vector<1x32xf32> to vector<2x32xf32>
    %159 = arith.mulf %157, %158 : vector<2x32xf32>
    %160 = arith.addf %155, %159 : vector<2x32xf32>
    %161 = vector.extract_strided_slice %141 {offsets = [0, 2], sizes = [2, 1], strides = [1, 1]} : vector<2x4xf32> to vector<2x1xf32>
    %162 = vector.broadcast %161 : vector<2x1xf32> to vector<2x32xf32>
    %163 = vector.broadcast %10 : vector<1x32xf32> to vector<2x32xf32>
    %164 = arith.mulf %162, %163 : vector<2x32xf32>
    %165 = arith.addf %160, %164 : vector<2x32xf32>
    %166 = vector.extract_strided_slice %141 {offsets = [0, 3], sizes = [2, 1], strides = [1, 1]} : vector<2x4xf32> to vector<2x1xf32>
    %167 = vector.broadcast %166 : vector<2x1xf32> to vector<2x32xf32>
    %168 = vector.broadcast %11 : vector<1x32xf32> to vector<2x32xf32>
    %169 = arith.mulf %167, %168 : vector<2x32xf32>
    %170 = arith.addf %165, %169 : vector<2x32xf32>
    %cst_60 = arith.constant 0.000000e+00 : f32
    %171 = vector.broadcast %cst_60 : f32 to vector<2x32xf32>
    %172 = arith.maximumf %170, %171 : vector<2x32xf32>
    %173 = arith.truncf %172 : vector<2x32xf32> to vector<2x32xbf16>
    %cst_61 = arith.constant dense<0.000000e+00> : vector<2x32xf32>
    %174 = tpu.matmul %173, %4, %cst_61 {dimension_numbers = #tpu.dot_dimension_numbers<[1], [0], [0], [1], [0, 0, 1, 1], [], []>} : vector<2x32xbf16>, vector<32x32xbf16>, vector<2x32xf32> -> vector<2x32xf32>
    %175 = vector.broadcast %1 : vector<1x32xf32> to vector<2x32xf32>
    %176 = arith.addf %174, %175 : vector<2x32xf32>
    %cst_62 = arith.constant 0.000000e+00 : f32
    %177 = vector.broadcast %cst_62 : f32 to vector<2x32xf32>
    %178 = arith.maximumf %176, %177 : vector<2x32xf32>
    %179 = arith.truncf %178 : vector<2x32xf32> to vector<2x32xbf16>
    %cst_63 = arith.constant dense<0.000000e+00> : vector<2x4xf32>
    %180 = tpu.matmul %179, %6, %cst_63 {dimension_numbers = #tpu.dot_dimension_numbers<[1], [0], [0], [1], [0, 0, 1, 1], [], []>} : vector<2x32xbf16>, vector<32x4xbf16>, vector<2x4xf32> -> vector<2x4xf32>
    %181 = vector.broadcast %2 : vector<1x4xf32> to vector<2x4xf32>
    %182 = arith.addf %180, %181 : vector<2x4xf32>
    %c2_64 = arith.constant 2 : index
    %c0_65 = arith.constant 0 : index
    %c0_66 = arith.constant 0 : index
    %183 = vector.load %arg2[%c2_64, %c0_65, %c0_66] : memref<8x2x4xf32, #tpu.memory_space<vmem>>, vector<1x2x4xf32>
    %184 = vector.shape_cast %183 : vector<1x2x4xf32> to vector<2x4xf32>
    %185 = arith.subf %182, %184 : vector<2x4xf32>
    %186 = arith.mulf %185, %185 : vector<2x4xf32>
    %cst_67 = arith.constant 0.980099976 : f32
    %187 = vector.broadcast %cst_67 : f32 to vector<2x4xf32>
    %188 = arith.mulf %186, %187 : vector<2x4xf32>
    %189 = arith.addf %148, %188 : vector<2x4xf32>
    %c3_68 = arith.constant 3 : index
    %c0_69 = arith.constant 0 : index
    %c0_70 = arith.constant 0 : index
    %190 = vector.load %arg11[%c3_68, %c0_69, %c0_70] : memref<8x2x32xf32, #tpu.memory_space<vmem>>, vector<1x2x32xf32>
    %191 = vector.shape_cast %190 : vector<1x2x32xf32> to vector<2x32xf32>
    %192 = vector.extract_strided_slice %182 {offsets = [0, 0], sizes = [2, 1], strides = [1, 1]} : vector<2x4xf32> to vector<2x1xf32>
    %193 = vector.broadcast %192 : vector<2x1xf32> to vector<2x32xf32>
    %194 = vector.broadcast %8 : vector<1x32xf32> to vector<2x32xf32>
    %195 = arith.mulf %193, %194 : vector<2x32xf32>
    %196 = arith.addf %191, %195 : vector<2x32xf32>
    %197 = vector.extract_strided_slice %182 {offsets = [0, 1], sizes = [2, 1], strides = [1, 1]} : vector<2x4xf32> to vector<2x1xf32>
    %198 = vector.broadcast %197 : vector<2x1xf32> to vector<2x32xf32>
    %199 = vector.broadcast %9 : vector<1x32xf32> to vector<2x32xf32>
    %200 = arith.mulf %198, %199 : vector<2x32xf32>
    %201 = arith.addf %196, %200 : vector<2x32xf32>
    %202 = vector.extract_strided_slice %182 {offsets = [0, 2], sizes = [2, 1], strides = [1, 1]} : vector<2x4xf32> to vector<2x1xf32>
    %203 = vector.broadcast %202 : vector<2x1xf32> to vector<2x32xf32>
    %204 = vector.broadcast %10 : vector<1x32xf32> to vector<2x32xf32>
    %205 = arith.mulf %203, %204 : vector<2x32xf32>
    %206 = arith.addf %201, %205 : vector<2x32xf32>
    %207 = vector.extract_strided_slice %182 {offsets = [0, 3], sizes = [2, 1], strides = [1, 1]} : vector<2x4xf32> to vector<2x1xf32>
    %208 = vector.broadcast %207 : vector<2x1xf32> to vector<2x32xf32>
    %209 = vector.broadcast %11 : vector<1x32xf32> to vector<2x32xf32>
    %210 = arith.mulf %208, %209 : vector<2x32xf32>
    %211 = arith.addf %206, %210 : vector<2x32xf32>
    %cst_71 = arith.constant 0.000000e+00 : f32
    %212 = vector.broadcast %cst_71 : f32 to vector<2x32xf32>
    %213 = arith.maximumf %211, %212 : vector<2x32xf32>
    %214 = arith.truncf %213 : vector<2x32xf32> to vector<2x32xbf16>
    %cst_72 = arith.constant dense<0.000000e+00> : vector<2x32xf32>
    %215 = tpu.matmul %214, %4, %cst_72 {dimension_numbers = #tpu.dot_dimension_numbers<[1], [0], [0], [1], [0, 0, 1, 1], [], []>} : vector<2x32xbf16>, vector<32x32xbf16>, vector<2x32xf32> -> vector<2x32xf32>
    %216 = vector.broadcast %1 : vector<1x32xf32> to vector<2x32xf32>
    %217 = arith.addf %215, %216 : vector<2x32xf32>
    %cst_73 = arith.constant 0.000000e+00 : f32
    %218 = vector.broadcast %cst_73 : f32 to vector<2x32xf32>
    %219 = arith.maximumf %217, %218 : vector<2x32xf32>
    %220 = arith.truncf %219 : vector<2x32xf32> to vector<2x32xbf16>
    %cst_74 = arith.constant dense<0.000000e+00> : vector<2x4xf32>
    %221 = tpu.matmul %220, %6, %cst_74 {dimension_numbers = #tpu.dot_dimension_numbers<[1], [0], [0], [1], [0, 0, 1, 1], [], []>} : vector<2x32xbf16>, vector<32x4xbf16>, vector<2x4xf32> -> vector<2x4xf32>
    %222 = vector.broadcast %2 : vector<1x4xf32> to vector<2x4xf32>
    %223 = arith.addf %221, %222 : vector<2x4xf32>
    %c3_75 = arith.constant 3 : index
    %c0_76 = arith.constant 0 : index
    %c0_77 = arith.constant 0 : index
    %224 = vector.load %arg2[%c3_75, %c0_76, %c0_77] : memref<8x2x4xf32, #tpu.memory_space<vmem>>, vector<1x2x4xf32>
    %225 = vector.shape_cast %224 : vector<1x2x4xf32> to vector<2x4xf32>
    %226 = arith.subf %223, %225 : vector<2x4xf32>
    %227 = arith.mulf %226, %226 : vector<2x4xf32>
    %cst_78 = arith.constant 9.702990e-01 : f32
    %228 = vector.broadcast %cst_78 : f32 to vector<2x4xf32>
    %229 = arith.mulf %227, %228 : vector<2x4xf32>
    %230 = arith.addf %189, %229 : vector<2x4xf32>
    %c4_79 = arith.constant 4 : index
    %c0_80 = arith.constant 0 : index
    %c0_81 = arith.constant 0 : index
    %231 = vector.load %arg11[%c4_79, %c0_80, %c0_81] : memref<8x2x32xf32, #tpu.memory_space<vmem>>, vector<1x2x32xf32>
    %232 = vector.shape_cast %231 : vector<1x2x32xf32> to vector<2x32xf32>
    %233 = vector.extract_strided_slice %223 {offsets = [0, 0], sizes = [2, 1], strides = [1, 1]} : vector<2x4xf32> to vector<2x1xf32>
    %234 = vector.broadcast %233 : vector<2x1xf32> to vector<2x32xf32>
    %235 = vector.broadcast %8 : vector<1x32xf32> to vector<2x32xf32>
    %236 = arith.mulf %234, %235 : vector<2x32xf32>
    %237 = arith.addf %232, %236 : vector<2x32xf32>
    %238 = vector.extract_strided_slice %223 {offsets = [0, 1], sizes = [2, 1], strides = [1, 1]} : vector<2x4xf32> to vector<2x1xf32>
    %239 = vector.broadcast %238 : vector<2x1xf32> to vector<2x32xf32>
    %240 = vector.broadcast %9 : vector<1x32xf32> to vector<2x32xf32>
    %241 = arith.mulf %239, %240 : vector<2x32xf32>
    %242 = arith.addf %237, %241 : vector<2x32xf32>
    %243 = vector.extract_strided_slice %223 {offsets = [0, 2], sizes = [2, 1], strides = [1, 1]} : vector<2x4xf32> to vector<2x1xf32>
    %244 = vector.broadcast %243 : vector<2x1xf32> to vector<2x32xf32>
    %245 = vector.broadcast %10 : vector<1x32xf32> to vector<2x32xf32>
    %246 = arith.mulf %244, %245 : vector<2x32xf32>
    %247 = arith.addf %242, %246 : vector<2x32xf32>
    %248 = vector.extract_strided_slice %223 {offsets = [0, 3], sizes = [2, 1], strides = [1, 1]} : vector<2x4xf32> to vector<2x1xf32>
    %249 = vector.broadcast %248 : vector<2x1xf32> to vector<2x32xf32>
    %250 = vector.broadcast %11 : vector<1x32xf32> to vector<2x32xf32>
    %251 = arith.mulf %249, %250 : vector<2x32xf32>
    %252 = arith.addf %247, %251 : vector<2x32xf32>
    %cst_82 = arith.constant 0.000000e+00 : f32
    %253 = vector.broadcast %cst_82 : f32 to vector<2x32xf32>
    %254 = arith.maximumf %252, %253 : vector<2x32xf32>
    %255 = arith.truncf %254 : vector<2x32xf32> to vector<2x32xbf16>
    %cst_83 = arith.constant dense<0.000000e+00> : vector<2x32xf32>
    %256 = tpu.matmul %255, %4, %cst_83 {dimension_numbers = #tpu.dot_dimension_numbers<[1], [0], [0], [1], [0, 0, 1, 1], [], []>} : vector<2x32xbf16>, vector<32x32xbf16>, vector<2x32xf32> -> vector<2x32xf32>
    %257 = vector.broadcast %1 : vector<1x32xf32> to vector<2x32xf32>
    %258 = arith.addf %256, %257 : vector<2x32xf32>
    %cst_84 = arith.constant 0.000000e+00 : f32
    %259 = vector.broadcast %cst_84 : f32 to vector<2x32xf32>
    %260 = arith.maximumf %258, %259 : vector<2x32xf32>
    %261 = arith.truncf %260 : vector<2x32xf32> to vector<2x32xbf16>
    %cst_85 = arith.constant dense<0.000000e+00> : vector<2x4xf32>
    %262 = tpu.matmul %261, %6, %cst_85 {dimension_numbers = #tpu.dot_dimension_numbers<[1], [0], [0], [1], [0, 0, 1, 1], [], []>} : vector<2x32xbf16>, vector<32x4xbf16>, vector<2x4xf32> -> vector<2x4xf32>
    %263 = vector.broadcast %2 : vector<1x4xf32> to vector<2x4xf32>
    %264 = arith.addf %262, %263 : vector<2x4xf32>
    %c4_86 = arith.constant 4 : index
    %c0_87 = arith.constant 0 : index
    %c0_88 = arith.constant 0 : index
    %265 = vector.load %arg2[%c4_86, %c0_87, %c0_88] : memref<8x2x4xf32, #tpu.memory_space<vmem>>, vector<1x2x4xf32>
    %266 = vector.shape_cast %265 : vector<1x2x4xf32> to vector<2x4xf32>
    %267 = arith.subf %264, %266 : vector<2x4xf32>
    %268 = arith.mulf %267, %267 : vector<2x4xf32>
    %cst_89 = arith.constant 9.605960e-01 : f32
    %269 = vector.broadcast %cst_89 : f32 to vector<2x4xf32>
    %270 = arith.mulf %268, %269 : vector<2x4xf32>
    %271 = arith.addf %230, %270 : vector<2x4xf32>
    %c5_90 = arith.constant 5 : index
    %c0_91 = arith.constant 0 : index
    %c0_92 = arith.constant 0 : index
    %272 = vector.load %arg11[%c5_90, %c0_91, %c0_92] : memref<8x2x32xf32, #tpu.memory_space<vmem>>, vector<1x2x32xf32>
    %273 = vector.shape_cast %272 : vector<1x2x32xf32> to vector<2x32xf32>
    %274 = vector.extract_strided_slice %264 {offsets = [0, 0], sizes = [2, 1], strides = [1, 1]} : vector<2x4xf32> to vector<2x1xf32>
    %275 = vector.broadcast %274 : vector<2x1xf32> to vector<2x32xf32>
    %276 = vector.broadcast %8 : vector<1x32xf32> to vector<2x32xf32>
    %277 = arith.mulf %275, %276 : vector<2x32xf32>
    %278 = arith.addf %273, %277 : vector<2x32xf32>
    %279 = vector.extract_strided_slice %264 {offsets = [0, 1], sizes = [2, 1], strides = [1, 1]} : vector<2x4xf32> to vector<2x1xf32>
    %280 = vector.broadcast %279 : vector<2x1xf32> to vector<2x32xf32>
    %281 = vector.broadcast %9 : vector<1x32xf32> to vector<2x32xf32>
    %282 = arith.mulf %280, %281 : vector<2x32xf32>
    %283 = arith.addf %278, %282 : vector<2x32xf32>
    %284 = vector.extract_strided_slice %264 {offsets = [0, 2], sizes = [2, 1], strides = [1, 1]} : vector<2x4xf32> to vector<2x1xf32>
    %285 = vector.broadcast %284 : vector<2x1xf32> to vector<2x32xf32>
    %286 = vector.broadcast %10 : vector<1x32xf32> to vector<2x32xf32>
    %287 = arith.mulf %285, %286 : vector<2x32xf32>
    %288 = arith.addf %283, %287 : vector<2x32xf32>
    %289 = vector.extract_strided_slice %264 {offsets = [0, 3], sizes = [2, 1], strides = [1, 1]} : vector<2x4xf32> to vector<2x1xf32>
    %290 = vector.broadcast %289 : vector<2x1xf32> to vector<2x32xf32>
    %291 = vector.broadcast %11 : vector<1x32xf32> to vector<2x32xf32>
    %292 = arith.mulf %290, %291 : vector<2x32xf32>
    %293 = arith.addf %288, %292 : vector<2x32xf32>
    %cst_93 = arith.constant 0.000000e+00 : f32
    %294 = vector.broadcast %cst_93 : f32 to vector<2x32xf32>
    %295 = arith.maximumf %293, %294 : vector<2x32xf32>
    %296 = arith.truncf %295 : vector<2x32xf32> to vector<2x32xbf16>
    %cst_94 = arith.constant dense<0.000000e+00> : vector<2x32xf32>
    %297 = tpu.matmul %296, %4, %cst_94 {dimension_numbers = #tpu.dot_dimension_numbers<[1], [0], [0], [1], [0, 0, 1, 1], [], []>} : vector<2x32xbf16>, vector<32x32xbf16>, vector<2x32xf32> -> vector<2x32xf32>
    %298 = vector.broadcast %1 : vector<1x32xf32> to vector<2x32xf32>
    %299 = arith.addf %297, %298 : vector<2x32xf32>
    %cst_95 = arith.constant 0.000000e+00 : f32
    %300 = vector.broadcast %cst_95 : f32 to vector<2x32xf32>
    %301 = arith.maximumf %299, %300 : vector<2x32xf32>
    %302 = arith.truncf %301 : vector<2x32xf32> to vector<2x32xbf16>
    %cst_96 = arith.constant dense<0.000000e+00> : vector<2x4xf32>
    %303 = tpu.matmul %302, %6, %cst_96 {dimension_numbers = #tpu.dot_dimension_numbers<[1], [0], [0], [1], [0, 0, 1, 1], [], []>} : vector<2x32xbf16>, vector<32x4xbf16>, vector<2x4xf32> -> vector<2x4xf32>
    %304 = vector.broadcast %2 : vector<1x4xf32> to vector<2x4xf32>
    %305 = arith.addf %303, %304 : vector<2x4xf32>
    %c5_97 = arith.constant 5 : index
    %c0_98 = arith.constant 0 : index
    %c0_99 = arith.constant 0 : index
    %306 = vector.load %arg2[%c5_97, %c0_98, %c0_99] : memref<8x2x4xf32, #tpu.memory_space<vmem>>, vector<1x2x4xf32>
    %307 = vector.shape_cast %306 : vector<1x2x4xf32> to vector<2x4xf32>
    %308 = arith.subf %305, %307 : vector<2x4xf32>
    %309 = arith.mulf %308, %308 : vector<2x4xf32>
    %cst_100 = arith.constant 9.509900e-01 : f32
    %310 = vector.broadcast %cst_100 : f32 to vector<2x4xf32>
    %311 = arith.mulf %309, %310 : vector<2x4xf32>
    %312 = arith.addf %271, %311 : vector<2x4xf32>
    %c6_101 = arith.constant 6 : index
    %c0_102 = arith.constant 0 : index
    %c0_103 = arith.constant 0 : index
    %313 = vector.load %arg11[%c6_101, %c0_102, %c0_103] : memref<8x2x32xf32, #tpu.memory_space<vmem>>, vector<1x2x32xf32>
    %314 = vector.shape_cast %313 : vector<1x2x32xf32> to vector<2x32xf32>
    %315 = vector.extract_strided_slice %305 {offsets = [0, 0], sizes = [2, 1], strides = [1, 1]} : vector<2x4xf32> to vector<2x1xf32>
    %316 = vector.broadcast %315 : vector<2x1xf32> to vector<2x32xf32>
    %317 = vector.broadcast %8 : vector<1x32xf32> to vector<2x32xf32>
    %318 = arith.mulf %316, %317 : vector<2x32xf32>
    %319 = arith.addf %314, %318 : vector<2x32xf32>
    %320 = vector.extract_strided_slice %305 {offsets = [0, 1], sizes = [2, 1], strides = [1, 1]} : vector<2x4xf32> to vector<2x1xf32>
    %321 = vector.broadcast %320 : vector<2x1xf32> to vector<2x32xf32>
    %322 = vector.broadcast %9 : vector<1x32xf32> to vector<2x32xf32>
    %323 = arith.mulf %321, %322 : vector<2x32xf32>
    %324 = arith.addf %319, %323 : vector<2x32xf32>
    %325 = vector.extract_strided_slice %305 {offsets = [0, 2], sizes = [2, 1], strides = [1, 1]} : vector<2x4xf32> to vector<2x1xf32>
    %326 = vector.broadcast %325 : vector<2x1xf32> to vector<2x32xf32>
    %327 = vector.broadcast %10 : vector<1x32xf32> to vector<2x32xf32>
    %328 = arith.mulf %326, %327 : vector<2x32xf32>
    %329 = arith.addf %324, %328 : vector<2x32xf32>
    %330 = vector.extract_strided_slice %305 {offsets = [0, 3], sizes = [2, 1], strides = [1, 1]} : vector<2x4xf32> to vector<2x1xf32>
    %331 = vector.broadcast %330 : vector<2x1xf32> to vector<2x32xf32>
    %332 = vector.broadcast %11 : vector<1x32xf32> to vector<2x32xf32>
    %333 = arith.mulf %331, %332 : vector<2x32xf32>
    %334 = arith.addf %329, %333 : vector<2x32xf32>
    %cst_104 = arith.constant 0.000000e+00 : f32
    %335 = vector.broadcast %cst_104 : f32 to vector<2x32xf32>
    %336 = arith.maximumf %334, %335 : vector<2x32xf32>
    %337 = arith.truncf %336 : vector<2x32xf32> to vector<2x32xbf16>
    %cst_105 = arith.constant dense<0.000000e+00> : vector<2x32xf32>
    %338 = tpu.matmul %337, %4, %cst_105 {dimension_numbers = #tpu.dot_dimension_numbers<[1], [0], [0], [1], [0, 0, 1, 1], [], []>} : vector<2x32xbf16>, vector<32x32xbf16>, vector<2x32xf32> -> vector<2x32xf32>
    %339 = vector.broadcast %1 : vector<1x32xf32> to vector<2x32xf32>
    %340 = arith.addf %338, %339 : vector<2x32xf32>
    %cst_106 = arith.constant 0.000000e+00 : f32
    %341 = vector.broadcast %cst_106 : f32 to vector<2x32xf32>
    %342 = arith.maximumf %340, %341 : vector<2x32xf32>
    %343 = arith.truncf %342 : vector<2x32xf32> to vector<2x32xbf16>
    %cst_107 = arith.constant dense<0.000000e+00> : vector<2x4xf32>
    %344 = tpu.matmul %343, %6, %cst_107 {dimension_numbers = #tpu.dot_dimension_numbers<[1], [0], [0], [1], [0, 0, 1, 1], [], []>} : vector<2x32xbf16>, vector<32x4xbf16>, vector<2x4xf32> -> vector<2x4xf32>
    %345 = vector.broadcast %2 : vector<1x4xf32> to vector<2x4xf32>
    %346 = arith.addf %344, %345 : vector<2x4xf32>
    %c6_108 = arith.constant 6 : index
    %c0_109 = arith.constant 0 : index
    %c0_110 = arith.constant 0 : index
    %347 = vector.load %arg2[%c6_108, %c0_109, %c0_110] : memref<8x2x4xf32, #tpu.memory_space<vmem>>, vector<1x2x4xf32>
    %348 = vector.shape_cast %347 : vector<1x2x4xf32> to vector<2x4xf32>
    %349 = arith.subf %346, %348 : vector<2x4xf32>
    %350 = arith.mulf %349, %349 : vector<2x4xf32>
    %cst_111 = arith.constant 0.941480159 : f32
    %351 = vector.broadcast %cst_111 : f32 to vector<2x4xf32>
    %352 = arith.mulf %350, %351 : vector<2x4xf32>
    %353 = arith.addf %312, %352 : vector<2x4xf32>
    %c7_112 = arith.constant 7 : index
    %c0_113 = arith.constant 0 : index
    %c0_114 = arith.constant 0 : index
    %354 = vector.load %arg11[%c7_112, %c0_113, %c0_114] : memref<8x2x32xf32, #tpu.memory_space<vmem>>, vector<1x2x32xf32>
    %355 = vector.shape_cast %354 : vector<1x2x32xf32> to vector<2x32xf32>
    %356 = vector.extract_strided_slice %346 {offsets = [0, 0], sizes = [2, 1], strides = [1, 1]} : vector<2x4xf32> to vector<2x1xf32>
    %357 = vector.broadcast %356 : vector<2x1xf32> to vector<2x32xf32>
    %358 = vector.broadcast %8 : vector<1x32xf32> to vector<2x32xf32>
    %359 = arith.mulf %357, %358 : vector<2x32xf32>
    %360 = arith.addf %355, %359 : vector<2x32xf32>
    %361 = vector.extract_strided_slice %346 {offsets = [0, 1], sizes = [2, 1], strides = [1, 1]} : vector<2x4xf32> to vector<2x1xf32>
    %362 = vector.broadcast %361 : vector<2x1xf32> to vector<2x32xf32>
    %363 = vector.broadcast %9 : vector<1x32xf32> to vector<2x32xf32>
    %364 = arith.mulf %362, %363 : vector<2x32xf32>
    %365 = arith.addf %360, %364 : vector<2x32xf32>
    %366 = vector.extract_strided_slice %346 {offsets = [0, 2], sizes = [2, 1], strides = [1, 1]} : vector<2x4xf32> to vector<2x1xf32>
    %367 = vector.broadcast %366 : vector<2x1xf32> to vector<2x32xf32>
    %368 = vector.broadcast %10 : vector<1x32xf32> to vector<2x32xf32>
    %369 = arith.mulf %367, %368 : vector<2x32xf32>
    %370 = arith.addf %365, %369 : vector<2x32xf32>
    %371 = vector.extract_strided_slice %346 {offsets = [0, 3], sizes = [2, 1], strides = [1, 1]} : vector<2x4xf32> to vector<2x1xf32>
    %372 = vector.broadcast %371 : vector<2x1xf32> to vector<2x32xf32>
    %373 = vector.broadcast %11 : vector<1x32xf32> to vector<2x32xf32>
    %374 = arith.mulf %372, %373 : vector<2x32xf32>
    %375 = arith.addf %370, %374 : vector<2x32xf32>
    %cst_115 = arith.constant 0.000000e+00 : f32
    %376 = vector.broadcast %cst_115 : f32 to vector<2x32xf32>
    %377 = arith.maximumf %375, %376 : vector<2x32xf32>
    %378 = arith.truncf %377 : vector<2x32xf32> to vector<2x32xbf16>
    %cst_116 = arith.constant dense<0.000000e+00> : vector<2x32xf32>
    %379 = tpu.matmul %378, %4, %cst_116 {dimension_numbers = #tpu.dot_dimension_numbers<[1], [0], [0], [1], [0, 0, 1, 1], [], []>} : vector<2x32xbf16>, vector<32x32xbf16>, vector<2x32xf32> -> vector<2x32xf32>
    %380 = vector.broadcast %1 : vector<1x32xf32> to vector<2x32xf32>
    %381 = arith.addf %379, %380 : vector<2x32xf32>
    %cst_117 = arith.constant 0.000000e+00 : f32
    %382 = vector.broadcast %cst_117 : f32 to vector<2x32xf32>
    %383 = arith.maximumf %381, %382 : vector<2x32xf32>
    %384 = arith.truncf %383 : vector<2x32xf32> to vector<2x32xbf16>
    %cst_118 = arith.constant dense<0.000000e+00> : vector<2x4xf32>
    %385 = tpu.matmul %384, %6, %cst_118 {dimension_numbers = #tpu.dot_dimension_numbers<[1], [0], [0], [1], [0, 0, 1, 1], [], []>} : vector<2x32xbf16>, vector<32x4xbf16>, vector<2x4xf32> -> vector<2x4xf32>
    %386 = vector.broadcast %2 : vector<1x4xf32> to vector<2x4xf32>
    %387 = arith.addf %385, %386 : vector<2x4xf32>
    %c7_119 = arith.constant 7 : index
    %c0_120 = arith.constant 0 : index
    %c0_121 = arith.constant 0 : index
    %388 = vector.load %arg2[%c7_119, %c0_120, %c0_121] : memref<8x2x4xf32, #tpu.memory_space<vmem>>, vector<1x2x4xf32>
    %389 = vector.shape_cast %388 : vector<1x2x4xf32> to vector<2x4xf32>
    %390 = arith.subf %387, %389 : vector<2x4xf32>
    %391 = arith.mulf %390, %390 : vector<2x4xf32>
    %cst_122 = arith.constant 0.932065367 : f32
    %392 = vector.broadcast %cst_122 : f32 to vector<2x4xf32>
    %393 = arith.mulf %391, %392 : vector<2x4xf32>
    %394 = arith.addf %353, %393 : vector<2x4xf32>
    %395 = vector.shape_cast %394 : vector<2x4xf32> to vector<1x2x4xf32>
    %cst_123 = arith.constant dense<0.000000e+00> : vector<1xf32>
    %396 = vector.multi_reduction <add>, %395, %cst_123 [1, 2] : vector<1x2x4xf32> to vector<1xf32>
    %397 = vector.shape_cast %396 : vector<1xf32> to vector<1x1x1xf32>
    %398 = vector.extract %397[0, 0, 0] : f32 from vector<1x1x1xf32>
    %cst_124 = arith.constant 1.250000e-01 : f32
    %399 = arith.mulf %398, %cst_124 : f32
    %c0_125 = arith.constant 0 : index
    %c0_126 = arith.constant 0 : index
    %400 = memref.load %arg10[%c0_125, %c0_126] : memref<1x1xf32, #tpu.memory_space<smem>>
    memref.store %399, %arg10[%c0_125, %c0_126] : memref<1x1xf32, #tpu.memory_space<smem>>
    return
  }
}

</mosaic_0001>

<bundles_post_ra>
// kernel: tpu_custom_call.1
= control target key start
LH: loop header
LB: loop body
LE: loop exit
PB: predicated region body
PF: predicated region fallthrough
CT: control target
= control target key end

     0   :  { %vm62_vm0 = vcmask 1040384   ;;  %vm63_vm1 = vcmask 1041408   ;;  %v1432_v1 = vmov 0.0   ;;  %v1433_v3 = vmov 65535   ;;  %s1801_s0 = inlined_call_operand.vmem [shape: f32[2,4], index: 0, kind: input, shape index: {}]   ;;  %s1802_s1 = inlined_call_operand.vmem [shape: f32[16,3], index: 1, kind: input, shape index: {}]   ;;  %s1803_s2 = inlined_call_operand.vmem [shape: f32[8,2,4], index: 2, kind: input, shape index: {}]   ;;  %s1804_s3 = inlined_call_operand.vmem [shape: f32[4,32], index: 3, kind: input, shape index: {}]   ;;  %s1805_s4 = inlined_call_operand.vmem [shape: f32[3,32], index: 4, kind: input, shape index: {}]   ;;  %s1806_s5 = inlined_call_operand.vmem [shape: f32[1,32], index: 5, kind: input, shape index: {}]   ;;  %s1807_s6 = inlined_call_operand.vmem [shape: f32[32,32], index: 6, kind: input, shape index: {}]   ;;  %s1808_s7 = inlined_call_operand.vmem [shape: f32[1,32], index: 7, kind: input, shape index: {}]   ;;  %s1809_s8 = inlined_call_operand.vmem [shape: f32[32,4], index: 8, kind: input, shape index: {}]   ;;  %s1810_s9 = inlined_call_operand.vmem [shape: f32[1,4], index: 9, kind: input, shape index: {}]   ;;  %s1811_s10 = inlined_call_operand.hbm [shape: f32[1,1], index: 10, kind: output, shape index: {}]  }
   0x1   :  { %v56_v0 = vld [vmem:[%s1805_s4] sm:$0x7]  ;;  %1245 = vmatprep.subr.bf16.mxu0 %v1432_v1  ;;  %v64_v4 = vsel %vm62_vm0, 4294967295, %v1433_v3  ;;  %v54_v6 = vld [vmem:[%s1802_s1 + $0x8] sm:$0xff]  ;;  %1251 = vmatprep.subr.bf16.mxu1 %v1432_v1  ;;  %vm1434_vm2 = vmmov 0   ;;  %v1435_v10 = vmov 0  }
   0x2   :  { %v57_v2 = vpack.c.bf16 %v56_v0, %v56_v0  ;;  %v53_v5 = vld [vmem:[%s1802_s1] sm:$0xff]  ;;  %v65_v7 = vsel %vm63_vm1, %v64_v4, 0  ;;  %1247 = vmatprep.mubr.msk.bf16.mxu0 %vm1434_vm2, %v1432_v1  ;;  %1255 = vmatprep.mubr.msk.bf16.mxu1 %vm1434_vm2, %v1432_v1  ;;  %v1436_v11 = vmov 2  }
   0x3   :  { %v137_v8 = vld [vmem:[%s1801_s0] sm:$0x3]  ;;  %1389 = vset.pattern.permute.xlu0 %v1435_v10  ;;  %1391 = vset.pattern.permute.xlu1 %v1436_v11 }
   0x4   :  { %v67_v9 = vand.u32 %v65_v7, %v57_v2 }
   0x5   :  { %15 = vsyncpa [#allocation4], 0  ;;  %v55_v12 = vpack.c.bf16 %v54_v6, %v53_v5  ;;  %141 = vperm.xlu0 %1389, %v137_v8   ;;  %161 = vperm.xlu1 %1391, %v137_v8   ;;  %vm58_vm3 = vcmask 23552   ;;  %v1437_v13 = vmov 1   ;;  %v1438_v14 = vmov 3   ;;  %v40_v15 = vld [vmem:[%s1807_s6] sm:$0xff] }
   0x6   :  { %1246 = vmatpush3.bf16.msra.mxu0 %v67_v9  ;;  %v41_v16 = vld [vmem:[%s1807_s6 + $0x8] sm:$0xff]  ;;  %v42_v18 = vld [vmem:[%s1807_s6 + $0x10] sm:$0xff]  ;;  %v43_v19 = vld [vmem:[%s1807_s6 + $0x18] sm:$0xff]  ;;  %v144_v24 = vlaneseq  ;;  %vm117_vm4 = vcmask 254976   ;;  %vm120_vm5 = vcmask 257026   ;;  %vm123_vm6 = vcmask 259076  }
   0x7   :  { %1259 = vmatprep.subr.bf16.mxu0 %v1432_v1  ;;  %v1527_v17 = vpack.c.bf16 %v41_v16, %v40_v15  ;;  %v1537_v20 = vpack.c.bf16 %v43_v19, %v42_v18  ;;  %v46_v21 = vld [vmem:[%s1809_s8] sm:$0xff]  ;;  %v47_v22 = vld [vmem:[%s1809_s8 + $0x8] sm:$0xff]  ;;  %vm126_vm7 = vcmask 261126   ;;  %vm188_vm8 = vcmask 261120   ;;  %v48_v57 = vld [vmem:[%s1809_s8 + $0x10] sm:$0xff]  ;;  %s1420_s11 = scalar_lea.hbm %s1811_s10, 16 }
   0x8   :  { %v1547_v23 = vpack.c.bf16 %v47_v22, %v46_v21  ;;  %v145_v25 = vshrl.u32 %v144_v24, 7  ;;  %v1169_v26 = vld [vmem:[%s1806_s5] ss:$0 sm:$0xff]  ;;  %v49_v58 = vld [vmem:[%s1809_s8 + $0x18] sm:$0xff]  ;;  %vm1141_vm9 = vcmask 25600   ;;  %p1421_p0 = scmp.ne.s32.totalorder %s1811_s10, %s1420_s11  ;;  %p1424_p1 = scmp.lt.u32.totalorder %s1420_s11, %s1811_s10 }
   0x9   :  { %1248 = vmatmul.mubr.msk.bf16.vlgmr.msra.gmra.mrb[0].mxu0 %vm58_vm3, %v55_v12  ;;  %1390 = vset.pattern.permute.xlu0 %v1437_v13  ;;  %v52_v34 = vld [vmem:[%s1804_s3] sm:$0xf]  ;;  %v1590_v59 = vpack.c.bf16 %v49_v58, %v48_v57 }
   0xa   :  { %151 = vperm.xlu0 %1390, %v137_v8   ;;  %1392 = vset.pattern.permute.xlu1 %v1438_v14  ;;  %v146_v31 = vsub.s32 0, %v145_v25  ;;  %v156_v32 = vsub.s32 1, %v145_v25  ;;  %v166_v39 = vsub.s32 2, %v145_v25  ;;  %v176_v41 = vsub.s32 3, %v145_v25  ;;  %v1597_v60 = vld [vmem:[%s1808_s7] ss:$0 sm:$0xff]  ;;  %p1426_p2 = pnand %p1424_p1, %p1421_p0 }
   0xb   :  { %171 = vperm.xlu1 %1392, %v137_v8   ;;  %1263 = vmatprep.mubr.msk.bf16.mxu0 %vm1434_vm2, %v1432_v1  ;;  %v1610_v5 = vld [vmem:[%s1810_s9] ss:$0 sm:$0xff] }
   0xc   :  { %1252 = vmatpush3.bf16.msra.mxu1 %v1527_v17  ;;  %1260 = vmatpush3.bf16.msra.mxu0 %v1547_v23  ;;  %v1565_v38 = vrot.slane %v52_v34, %v146_v31  ;;  %v1567_v40 = vrot.slane %v52_v34, %v156_v32  ;;  %v1570_v44 = vrot.slane %v52_v34, %v166_v39 }
   0xd   :  { %1253 = vmatprep.subr.bf16.mxu1 %v1432_v1  ;;  %1261 = vmatprep.subr.bf16.mxu0 %v1432_v1  ;;  %v1573_v46 = vrot.slane %v52_v34, %v176_v41 }
   0xf   :  { %1393 = vset.pattern.permute.xlu1 %v1435_v10 }
  0x10   :  { %1254 = vmatpush3.bf16.msra.mxu1 %v1537_v20  ;;  %1262 = vmatpush3.bf16.msra.mxu0 %v1590_v59 }
  0x11   :  { %1267 = vmatprep.subr.bf16.mxu1 %v1432_v1  ;;  %1275 = vmatprep.subr.bf16.mxu0 %v1432_v1 }
  0x84   :  { %v142_v28 = vpop.permute.xlu0 %141  ;;  %v162_v37 = vpop.permute.xlu1 %161 }
  0x85   :  { %v148_v43 = vmul.f32 %v1565_v38, %v142_v28  ;;  %v168_v50 = vmul.f32 %v1570_v44, %v162_v37 }
  0x89   :  { %v152_v42 = vpop.permute.xlu0 %151 }
  0x8a   :  { %v158_v45 = vmul.f32 %v1567_v40, %v152_v42  ;;  %v172_v48 = vpop.permute.xlu1 %171  ;;  %v283_v42 = vld [vmem:[%s1803_s2] sm:$0x3] }
  0x8b   :  { %v178_v52 = vmul.f32 %v1573_v46, %v172_v48 }
  0xdc   :  { %v103_v27 = vpop.f32.mrb[0].mxu0 }
  0xdd   :  { %v116_v29 = vadd.f32 %v1169_v26, %v103_v27  ;;  %v1249_v30 = vpop.f32.mrb[1].mxu0 }
  0xde   :  { %v106_v33 = vpop.f32.mrb[2].mxu0 }
  0xdf   :  { %118 = vst.msk [vmem:[#allocation2] sm:$0x3] %vm117_vm4, %v116_v29  ;;  %v128_v35 = vadd.f32 %v1169_v26, %v106_v33  ;;  %v1250_v36 = vpop.f32.mrb[3].mxu0 }
  0xe0   :  { %121 = vst.msk [vmem:[#allocation2] sm:$0xc] %vm120_vm5, %v116_v29 }
  0xe1   :  { %124 = vst.msk [vmem:[#allocation2] sm:$0x30] %vm123_vm6, %v116_v29  ;;  %134 = vst.msk [vmem:[#allocation2 + $0x8] sm:$0x30] %vm123_vm6, %v128_v35 }
  0xe2   :  { %127 = vst.msk [vmem:[#allocation2] sm:$0xc0] %vm126_vm7, %v116_v29  ;;  %136 = vst.msk [vmem:[#allocation2 + $0x8] sm:$0xc0] %vm126_vm7, %v128_v35 }
  0xe3   :  { %130 = vst.msk [vmem:[#allocation2 + $0x8] sm:$0x3] %vm117_vm4, %v128_v35 }
  0xe4   :  { %132 = vst.msk [vmem:[#allocation2 + $0x8] sm:$0xc] %vm120_vm5, %v128_v35 }
  0xe6   :  { %v138_v47 = vld [vmem:[#allocation2] sm:$0x3] }
  0xe7   :  { %v149_v49 = vadd.f32 %v148_v43, %v138_v47  ;;  %v287_v19 = vld [vmem:[#allocation2 + $0x2] sm:$0x3] }
  0xe9   :  { %v159_v51 = vadd.f32 %v158_v45, %v149_v49  ;;  %v1176_v45 = vld [vmem:[%s1803_s2 + $0x2] sm:$0x3] }
  0xeb   :  { %v169_v53 = vadd.f32 %v168_v50, %v159_v51 }
  0xed   :  { %v179_v54 = vadd.f32 %v178_v52, %v169_v53 }
  0xef   :  { %v180_v55 = vmax.f32 %v179_v54, 0.0 }
  0xf1   :  { %v181_v56 = vpack.c.bf16 %v180_v55, %v180_v55 }
  0xf3   :  { %1256 = vmatmul.mubr.msk.bf16.vlgmr.msra.gmra.mrb[0].mxu1 %vm188_vm8, %v181_v56 }
  0xf4   :  { %1268 = vmatpush3.bf16.msra.mxu1 %v1527_v17  ;;  %1271 = vmatprep.mubr.msk.bf16.mxu1 %vm1434_vm2, %v1432_v1 }
  0xf5   :  { %1269 = vmatprep.subr.bf16.mxu1 %v1432_v1 }
  0xf8   :  { %1270 = vmatpush3.bf16.msra.mxu1 %v1537_v20 }
  0xf9   :  { %1283 = vmatprep.subr.bf16.mxu1 %v1432_v1 }
 0x1c6   :  { %v226_v61 = vpop.f32.mrb[0].mxu1 }
 0x1c7   :  { %v227_v62 = vadd.f32 %v1597_v60, %v226_v61  ;;  %v1257_v63 = vpop.f32.mrb[1].mxu1 }
 0x1c8   :  { %v229_v0 = vpop.f32.mrb[2].mxu1 }
 0x1c9   :  { %v232_v2 = vmax.f32 %v227_v62, 0.0  ;;  %v1258_v3 = vpop.f32.mrb[3].mxu1  ;;  %v409_v62 = vld [vmem:[#allocation2 + $0x4] sm:$0x3] }
 0x1cb   :  { %v233_v4 = vpack.c.bf16 %v232_v2, %v232_v2 }
 0x1cd   :  { %1264 = vmatmul.mubr.msk.bf16.vlgmr.msra.gmra.mrb[4].mxu0 %vm188_vm8, %v233_v4 }
 0x1ce   :  { %1276 = vmatpush3.bf16.msra.mxu0 %v1547_v23  ;;  %1279 = vmatprep.mubr.msk.bf16.mxu0 %vm1434_vm2, %v1432_v1 }
 0x1cf   :  { %1277 = vmatprep.subr.bf16.mxu0 %v1432_v1 }
 0x1d2   :  { %1278 = vmatpush3.bf16.msra.mxu0 %v1590_v59 }
 0x1d3   :  { %1291 = vmatprep.subr.bf16.mxu0 %v1432_v1 }
 0x2a0   :  { %v277_v6 = vpop.f32.mrb[4].mxu0 }
 0x2a1   :  { %v278_v7 = vadd.f32 %v1610_v5, %v277_v6  ;;  %v1265_v8 = vpop.f32.mrb[5].mxu0 }
 0x2a2   :  { %v280_v9 = vpop.f32.mrb[6].mxu0 }
 0x2a3   :  { %296 = vperm.xlu0 %1390, %v278_v7   ;;  %290 = vperm.xlu1 %1393, %v278_v7   ;;  %v1266_v12 = vpop.f32.mrb[7].mxu0  ;;  %v284_v50 = vsub.f32 %v278_v7, %v283_v42 }
 0x2a5   :  { %v285_v54 = vmul.f32 %v284_v50, %v284_v50 }
 0x2a7   :  { %1395 = vset.pattern.permute.xlu0 %v1438_v14  ;;  %1394 = vset.pattern.permute.xlu1 %v1436_v11 }
 0x2a8   :  { %308 = vperm.xlu0 %1395, %v278_v7   ;;  %302 = vperm.xlu1 %1394, %v278_v7  }
 0x2ac   :  { %1398 = vset.pattern.permute.xlu0 %v1436_v11  ;;  %1396 = vset.pattern.permute.xlu1 %v1435_v10 }
 0x322   :  { %v297_v15 = vpop.permute.xlu0 %296  ;;  %v291_v16 = vpop.permute.xlu1 %290 }
 0x323   :  { %v293_v18 = vmul.f32 %v291_v16, %v1565_v38  ;;  %v299_v21 = vmul.f32 %v297_v15, %v1567_v40 }
 0x325   :  { %v294_v22 = vadd.f32 %v293_v18, %v287_v19 }
 0x327   :  { %v309_v24 = vpop.permute.xlu0 %308  ;;  %v300_v25 = vadd.f32 %v299_v21, %v294_v22  ;;  %v303_v26 = vpop.permute.xlu1 %302 }
 0x328   :  { %v305_v27 = vmul.f32 %v303_v26, %v1570_v44  ;;  %v311_v28 = vmul.f32 %v309_v24, %v1573_v46 }
 0x32a   :  { %v306_v29 = vadd.f32 %v305_v27, %v300_v25  ;;  %v1179_v27 = vld [vmem:[%s1803_s2 + $0x4] sm:$0x3] }
 0x32c   :  { %v312_v30 = vadd.f32 %v311_v28, %v306_v29 }
 0x32e   :  { %v313_v31 = vmax.f32 %v312_v30, 0.0 }
 0x330   :  { %v314_v32 = vpack.c.bf16 %v313_v31, %v313_v31 }
 0x332   :  { %1272 = vmatmul.mubr.msk.bf16.vlgmr.msra.gmra.mrb[4].mxu1 %vm188_vm8, %v314_v32 }
 0x333   :  { %1284 = vmatpush3.bf16.msra.mxu1 %v1527_v17  ;;  %1287 = vmatprep.mubr.msk.bf16.mxu1 %vm1434_vm2, %v1432_v1 }
 0x334   :  { %1285 = vmatprep.subr.bf16.mxu1 %v1432_v1 }
 0x337   :  { %1286 = vmatpush3.bf16.msra.mxu1 %v1537_v20 }
 0x338   :  { %1299 = vmatprep.subr.bf16.mxu1 %v1432_v1 }
 0x405   :  { %v352_v33 = vpop.f32.mrb[4].mxu1 }
 0x406   :  { %v353_v34 = vadd.f32 %v1597_v60, %v352_v33  ;;  %v1273_v35 = vpop.f32.mrb[5].mxu1 }
 0x407   :  { %v355_v36 = vpop.f32.mrb[6].mxu1 }
 0x408   :  { %v358_v37 = vmax.f32 %v353_v34, 0.0  ;;  %v1274_v39 = vpop.f32.mrb[7].mxu1 }
 0x40a   :  { %v359_v41 = vpack.c.bf16 %v358_v37, %v358_v37 }
 0x40c   :  { %1280 = vmatmul.mubr.msk.bf16.vlgmr.msra.gmra.mrb[8].mxu0 %vm188_vm8, %v359_v41  ;;  %v531_v41 = vld [vmem:[#allocation2 + $0x6] sm:$0x3] }
 0x40d   :  { %1292 = vmatpush3.bf16.msra.mxu0 %v1547_v23  ;;  %1295 = vmatprep.mubr.msk.bf16.mxu0 %vm1434_vm2, %v1432_v1 }
 0x40e   :  { %1293 = vmatprep.subr.bf16.mxu0 %v1432_v1 }
 0x411   :  { %1294 = vmatpush3.bf16.msra.mxu0 %v1590_v59 }
 0x412   :  { %1307 = vmatprep.subr.bf16.mxu0 %v1432_v1 }
 0x4df   :  { %v397_v43 = vpop.f32.mrb[8].mxu0 }
 0x4e0   :  { %v398_v47 = vadd.f32 %v1610_v5, %v397_v43  ;;  %v1281_v48 = vpop.f32.mrb[9].mxu0 }
 0x4e1   :  { %v400_v49 = vpop.f32.mrb[10].mxu0 }
 0x4e2   :  { %v405_v51 = vsub.f32 %v398_v47, %v1176_v45  ;;  %424 = vperm.xlu0 %1398, %v398_v47   ;;  %412 = vperm.xlu1 %1396, %v398_v47   ;;  %v1282_v52 = vpop.f32.mrb[11].mxu0 }
 0x4e4   :  { %v406_v53 = vmul.f32 %v405_v51, %v405_v51 }
 0x4e6   :  { %v407_v55 = vmul.f32 0.99, %v406_v53  ;;  %1397 = vset.pattern.permute.xlu1 %v1437_v13  ;;  %1401 = vset.pattern.permute.xlu0 %v1437_v13 }
 0x4e7   :  { %418 = vperm.xlu1 %1397, %v398_v47  }
 0x4e8   :  { %v408_v56 = vadd.f32 %v407_v55, %v285_v54 }
 0x4eb   :  { %1399 = vset.pattern.permute.xlu1 %v1438_v14 }
 0x4ec   :  { %430 = vperm.xlu1 %1399, %v398_v47  }
 0x4f0   :  { %1400 = vset.pattern.permute.xlu1 %v1435_v10 }
 0x561   :  { %v413_v57 = vpop.permute.xlu1 %412  ;;  %v425_v61 = vpop.permute.xlu0 %424 }
 0x562   :  { %v415_v58 = vmul.f32 %v413_v57, %v1565_v38  ;;  %v427_v3 = vmul.f32 %v425_v61, %v1570_v44 }
 0x564   :  { %v416_v0 = vadd.f32 %v415_v58, %v409_v62 }
 0x566   :  { %v419_v63 = vpop.permute.xlu1 %418 }
 0x567   :  { %v421_v2 = vmul.f32 %v419_v63, %v1567_v40 }
 0x569   :  { %v422_v4 = vadd.f32 %v421_v2, %v416_v0  ;;  %v1182_v2 = vld [vmem:[%s1803_s2 + $0x6] sm:$0x3] }
 0x56b   :  { %v428_v6 = vadd.f32 %v427_v3, %v422_v4  ;;  %v431_v7 = vpop.permute.xlu1 %430 }
 0x56c   :  { %v433_v8 = vmul.f32 %v431_v7, %v1573_v46 }
 0x56e   :  { %v434_v9 = vadd.f32 %v433_v8, %v428_v6 }
 0x570   :  { %v435_v12 = vmax.f32 %v434_v9, 0.0 }
 0x572   :  { %v436_v15 = vpack.c.bf16 %v435_v12, %v435_v12 }
 0x574   :  { %1288 = vmatmul.mubr.msk.bf16.vlgmr.msra.gmra.mrb[8].mxu1 %vm188_vm8, %v436_v15 }
 0x575   :  { %1300 = vmatpush3.bf16.msra.mxu1 %v1527_v17  ;;  %1303 = vmatprep.mubr.msk.bf16.mxu1 %vm1434_vm2, %v1432_v1 }
 0x576   :  { %1301 = vmatprep.subr.bf16.mxu1 %v1432_v1 }
 0x579   :  { %1302 = vmatpush3.bf16.msra.mxu1 %v1537_v20 }
 0x57a   :  { %1315 = vmatprep.subr.bf16.mxu1 %v1432_v1 }
 0x647   :  { %v474_v16 = vpop.f32.mrb[8].mxu1 }
 0x648   :  { %v475_v18 = vadd.f32 %v1597_v60, %v474_v16  ;;  %v1289_v19 = vpop.f32.mrb[9].mxu1 }
 0x649   :  { %v477_v21 = vpop.f32.mrb[10].mxu1 }
 0x64a   :  { %v480_v22 = vmax.f32 %v475_v18, 0.0  ;;  %v1290_v24 = vpop.f32.mrb[11].mxu1  ;;  %v653_v21 = vld [vmem:[#allocation2 + $0x8] sm:$0x3] }
 0x64c   :  { %v481_v25 = vpack.c.bf16 %v480_v22, %v480_v22 }
 0x64e   :  { %1296 = vmatmul.mubr.msk.bf16.vlgmr.msra.gmra.mrb[12].mxu0 %vm188_vm8, %v481_v25 }
 0x64f   :  { %1308 = vmatpush3.bf16.msra.mxu0 %v1547_v23  ;;  %1311 = vmatprep.mubr.msk.bf16.mxu0 %vm1434_vm2, %v1432_v1 }
 0x650   :  { %1309 = vmatprep.subr.bf16.mxu0 %v1432_v1 }
 0x653   :  { %1310 = vmatpush3.bf16.msra.mxu0 %v1590_v59 }
 0x654   :  { %1323 = vmatprep.subr.bf16.mxu0 %v1432_v1 }
 0x721   :  { %v519_v26 = vpop.f32.mrb[12].mxu0 }
 0x722   :  { %v520_v28 = vadd.f32 %v1610_v5, %v519_v26  ;;  %v1297_v29 = vpop.f32.mrb[13].mxu0 }
 0x723   :  { %v522_v30 = vpop.f32.mrb[14].mxu0 }
 0x724   :  { %v527_v31 = vsub.f32 %v520_v28, %v1179_v27  ;;  %540 = vperm.xlu0 %1401, %v520_v28   ;;  %534 = vperm.xlu1 %1400, %v520_v28   ;;  %v1298_v32 = vpop.f32.mrb[15].mxu0 }
 0x726   :  { %v528_v33 = vmul.f32 %v527_v31, %v527_v31 }
 0x728   :  { %v529_v34 = vmul.f32 0.9801, %v528_v33  ;;  %1402 = vset.pattern.permute.xlu1 %v1436_v11  ;;  %1404 = vset.pattern.permute.xlu0 %v1435_v10 }
 0x729   :  { %546 = vperm.xlu1 %1402, %v520_v28  }
 0x72a   :  { %v530_v35 = vadd.f32 %v529_v34, %v408_v56 }
 0x72d   :  { %1403 = vset.pattern.permute.xlu1 %v1438_v14 }
 0x72e   :  { %552 = vperm.xlu1 %1403, %v520_v28  }
 0x732   :  { %1405 = vset.pattern.permute.xlu1 %v1437_v13 }
 0x7a3   :  { %v535_v36 = vpop.permute.xlu1 %534  ;;  %v541_v39 = vpop.permute.xlu0 %540 }
 0x7a4   :  { %v537_v37 = vmul.f32 %v535_v36, %v1565_v38  ;;  %v543_v43 = vmul.f32 %v541_v39, %v1567_v40 }
 0x7a6   :  { %v538_v42 = vadd.f32 %v537_v37, %v531_v41 }
 0x7a8   :  { %v547_v45 = vpop.permute.xlu1 %546  ;;  %v544_v47 = vadd.f32 %v543_v43, %v538_v42 }
 0x7a9   :  { %v549_v48 = vmul.f32 %v547_v45, %v1570_v44  ;;  %v1185_v45 = vld [vmem:[%s1803_s2 + $0x8] sm:$0x3] }
 0x7ab   :  { %v550_v50 = vadd.f32 %v549_v48, %v544_v47 }
 0x7ad   :  { %v553_v49 = vpop.permute.xlu1 %552 }
 0x7ae   :  { %v555_v51 = vmul.f32 %v553_v49, %v1573_v46 }
 0x7b0   :  { %v556_v52 = vadd.f32 %v555_v51, %v550_v50 }
 0x7b2   :  { %v557_v53 = vmax.f32 %v556_v52, 0.0 }
 0x7b4   :  { %v558_v54 = vpack.c.bf16 %v557_v53, %v557_v53 }
 0x7b6   :  { %1304 = vmatmul.mubr.msk.bf16.vlgmr.msra.gmra.mrb[12].mxu1 %vm188_vm8, %v558_v54 }
 0x7b7   :  { %1316 = vmatpush3.bf16.msra.mxu1 %v1527_v17  ;;  %1319 = vmatprep.mubr.msk.bf16.mxu1 %vm1434_vm2, %v1432_v1 }
 0x7b8   :  { %1317 = vmatprep.subr.bf16.mxu1 %v1432_v1 }
 0x7bb   :  { %1318 = vmatpush3.bf16.msra.mxu1 %v1537_v20 }
 0x7bc   :  { %1331 = vmatprep.subr.bf16.mxu1 %v1432_v1 }
 0x889   :  { %v596_v55 = vpop.f32.mrb[12].mxu1 }
 0x88a   :  { %v597_v56 = vadd.f32 %v1597_v60, %v596_v55  ;;  %v1305_v57 = vpop.f32.mrb[13].mxu1 }
 0x88b   :  { %v599_v58 = vpop.f32.mrb[14].mxu1 }
 0x88c   :  { %v602_v61 = vmax.f32 %v597_v56, 0.0  ;;  %v1306_v62 = vpop.f32.mrb[15].mxu1  ;;  %v775_v58 = vld [vmem:[#allocation2 + $0xa] sm:$0x3] }
 0x88e   :  { %v603_v63 = vpack.c.bf16 %v602_v61, %v602_v61 }
 0x890   :  { %1312 = vmatmul.mubr.msk.bf16.vlgmr.msra.gmra.mrb[16].mxu0 %vm188_vm8, %v603_v63 }
 0x891   :  { %1324 = vmatpush3.bf16.msra.mxu0 %v1547_v23  ;;  %1327 = vmatprep.mubr.msk.bf16.mxu0 %vm1434_vm2, %v1432_v1 }
 0x892   :  { %1325 = vmatprep.subr.bf16.mxu0 %v1432_v1 }
 0x895   :  { %1326 = vmatpush3.bf16.msra.mxu0 %v1590_v59 }
 0x896   :  { %1339 = vmatprep.subr.bf16.mxu0 %v1432_v1 }
 0x963   :  { %v641_v0 = vpop.f32.mrb[16].mxu0 }
 0x964   :  { %v642_v3 = vadd.f32 %v1610_v5, %v641_v0  ;;  %v1313_v4 = vpop.f32.mrb[17].mxu0 }
 0x965   :  { %v644_v6 = vpop.f32.mrb[18].mxu0 }
 0x966   :  { %v649_v7 = vsub.f32 %v642_v3, %v1182_v2  ;;  %662 = vperm.xlu1 %1405, %v642_v3   ;;  %656 = vperm.xlu0 %1404, %v642_v3   ;;  %v1314_v8 = vpop.f32.mrb[19].mxu0 }
 0x968   :  { %v650_v9 = vmul.f32 %v649_v7, %v649_v7 }
 0x96a   :  { %1406 = vset.pattern.permute.xlu1 %v1436_v11  ;;  %1407 = vset.pattern.permute.xlu0 %v1438_v14  ;;  %v651_v12 = vmul.f32 0.970299, %v650_v9 }
 0x96b   :  { %668 = vperm.xlu1 %1406, %v642_v3   ;;  %674 = vperm.xlu0 %1407, %v642_v3  }
 0x96c   :  { %v652_v15 = vadd.f32 %v651_v12, %v530_v35 }
 0x96f   :  { %1408 = vset.pattern.permute.xlu1 %v1435_v10  ;;  %1410 = vset.pattern.permute.xlu0 %v1436_v11 }
 0x9e5   :  { %v663_v16 = vpop.permute.xlu1 %662  ;;  %v657_v18 = vpop.permute.xlu0 %656 }
 0x9e6   :  { %v659_v19 = vmul.f32 %v657_v18, %v1565_v38  ;;  %v665_v22 = vmul.f32 %v663_v16, %v1567_v40 }
 0x9e8   :  { %v660_v24 = vadd.f32 %v659_v19, %v653_v21 }
 0x9ea   :  { %v669_v25 = vpop.permute.xlu1 %668  ;;  %v666_v26 = vadd.f32 %v665_v22, %v660_v24  ;;  %v675_v27 = vpop.permute.xlu0 %674 }
 0x9eb   :  { %v671_v28 = vmul.f32 %v669_v25, %v1570_v44  ;;  %v677_v30 = vmul.f32 %v675_v27, %v1573_v46  ;;  %v1188_v25 = vld [vmem:[%s1803_s2 + $0xa] sm:$0x3] }
 0x9ed   :  { %v672_v29 = vadd.f32 %v671_v28, %v666_v26 }
 0x9ef   :  { %v678_v31 = vadd.f32 %v677_v30, %v672_v29 }
 0x9f1   :  { %v679_v32 = vmax.f32 %v678_v31, 0.0 }
 0x9f3   :  { %v680_v33 = vpack.c.bf16 %v679_v32, %v679_v32 }
 0x9f5   :  { %1320 = vmatmul.mubr.msk.bf16.vlgmr.msra.gmra.mrb[16].mxu1 %vm188_vm8, %v680_v33 }
 0x9f6   :  { %1332 = vmatpush3.bf16.msra.mxu1 %v1527_v17  ;;  %1335 = vmatprep.mubr.msk.bf16.mxu1 %vm1434_vm2, %v1432_v1 }
 0x9f7   :  { %1333 = vmatprep.subr.bf16.mxu1 %v1432_v1 }
 0x9fa   :  { %1334 = vmatpush3.bf16.msra.mxu1 %v1537_v20 }
 0x9fb   :  { %1347 = vmatprep.subr.bf16.mxu1 %v1432_v1 }
 0xac8   :  { %v718_v34 = vpop.f32.mrb[16].mxu1 }
 0xac9   :  { %v719_v35 = vadd.f32 %v1597_v60, %v718_v34  ;;  %v1321_v36 = vpop.f32.mrb[17].mxu1 }
 0xaca   :  { %v721_v37 = vpop.f32.mrb[18].mxu1 }
 0xacb   :  { %v724_v39 = vmax.f32 %v719_v35, 0.0  ;;  %v1322_v41 = vpop.f32.mrb[19].mxu1  ;;  %v897_v37 = vld [vmem:[#allocation2 + $0xc] sm:$0x3] }
 0xacd   :  { %v725_v42 = vpack.c.bf16 %v724_v39, %v724_v39 }
 0xacf   :  { %1328 = vmatmul.mubr.msk.bf16.vlgmr.msra.gmra.mrb[20].mxu0 %vm188_vm8, %v725_v42 }
 0xad0   :  { %1340 = vmatpush3.bf16.msra.mxu0 %v1547_v23  ;;  %1343 = vmatprep.mubr.msk.bf16.mxu0 %vm1434_vm2, %v1432_v1 }
 0xad1   :  { %1341 = vmatprep.subr.bf16.mxu0 %v1432_v1 }
 0xad4   :  { %1342 = vmatpush3.bf16.msra.mxu0 %v1590_v59 }
 0xad5   :  { %1355 = vmatprep.subr.bf16.mxu0 %v1432_v1 }
 0xba2   :  { %v763_v43 = vpop.f32.mrb[20].mxu0 }
 0xba3   :  { %v764_v47 = vadd.f32 %v1610_v5, %v763_v43  ;;  %v1329_v48 = vpop.f32.mrb[21].mxu0 }
 0xba4   :  { %v766_v49 = vpop.f32.mrb[22].mxu0 }
 0xba5   :  { %790 = vperm.xlu0 %1410, %v764_v47   ;;  %778 = vperm.xlu1 %1408, %v764_v47   ;;  %v1330_v50 = vpop.f32.mrb[23].mxu0  ;;  %v771_v51 = vsub.f32 %v764_v47, %v1185_v45 }
 0xba7   :  { %v772_v52 = vmul.f32 %v771_v51, %v771_v51 }
 0xba9   :  { %1409 = vset.pattern.permute.xlu1 %v1437_v13  ;;  %1413 = vset.pattern.permute.xlu0 %v1437_v13  ;;  %v773_v53 = vmul.f32 0.960596, %v772_v52 }
 0xbaa   :  { %784 = vperm.xlu1 %1409, %v764_v47  }
 0xbab   :  { %v774_v54 = vadd.f32 %v773_v53, %v652_v15 }
 0xbae   :  { %1411 = vset.pattern.permute.xlu1 %v1438_v14 }
 0xbaf   :  { %796 = vperm.xlu1 %1411, %v764_v47  }
 0xbb3   :  { %1412 = vset.pattern.permute.xlu1 %v1435_v10 }
 0xc24   :  { %v779_v55 = vpop.permute.xlu1 %778  ;;  %v791_v57 = vpop.permute.xlu0 %790 }
 0xc25   :  { %v781_v56 = vmul.f32 %v779_v55, %v1565_v38  ;;  %v793_v0 = vmul.f32 %v791_v57, %v1570_v44 }
 0xc27   :  { %v782_v62 = vadd.f32 %v781_v56, %v775_v58 }
 0xc29   :  { %v785_v61 = vpop.permute.xlu1 %784 }
 0xc2a   :  { %v787_v63 = vmul.f32 %v785_v61, %v1567_v40 }
 0xc2c   :  { %v788_v2 = vadd.f32 %v787_v63, %v782_v62 }
 0xc2e   :  { %v794_v3 = vadd.f32 %v793_v0, %v788_v2  ;;  %v797_v4 = vpop.permute.xlu1 %796 }
 0xc2f   :  { %v799_v6 = vmul.f32 %v797_v4, %v1573_v46 }
 0xc31   :  { %v800_v7 = vadd.f32 %v799_v6, %v794_v3  ;;  %v1019_v6 = vld [vmem:[#allocation2 + $0xe] sm:$0x3] }
 0xc33   :  { %v801_v8 = vmax.f32 %v800_v7, 0.0 }
 0xc35   :  { %v802_v9 = vpack.c.bf16 %v801_v8, %v801_v8 }
 0xc37   :  { %1336 = vmatmul.mubr.msk.bf16.vlgmr.msra.gmra.mrb[20].mxu1 %vm188_vm8, %v802_v9 }
 0xc38   :  { %1348 = vmatpush3.bf16.msra.mxu1 %v1527_v17  ;;  %1351 = vmatprep.mubr.msk.bf16.mxu1 %vm1434_vm2, %v1432_v1 }
 0xc39   :  { %1349 = vmatprep.subr.bf16.mxu1 %v1432_v1 }
 0xc3c   :  { %1350 = vmatpush3.bf16.msra.mxu1 %v1537_v20 }
 0xc3d   :  { %1363 = vmatprep.subr.bf16.mxu1 %v1432_v1 }
 0xd0a   :  { %v840_v12 = vpop.f32.mrb[20].mxu1 }
 0xd0b   :  { %v841_v15 = vadd.f32 %v1597_v60, %v840_v12  ;;  %v1337_v16 = vpop.f32.mrb[21].mxu1 }
 0xd0c   :  { %v843_v18 = vpop.f32.mrb[22].mxu1 }
 0xd0d   :  { %v846_v19 = vmax.f32 %v841_v15, 0.0  ;;  %v1338_v21 = vpop.f32.mrb[23].mxu1 }
 0xd0f   :  { %v847_v22 = vpack.c.bf16 %v846_v19, %v846_v19 }
 0xd11   :  { %1344 = vmatmul.mubr.msk.bf16.vlgmr.msra.gmra.mrb[24].mxu0 %vm188_vm8, %v847_v22 }
 0xd12   :  { %1356 = vmatpush3.bf16.msra.mxu0 %v1547_v23  ;;  %1359 = vmatprep.mubr.msk.bf16.mxu0 %vm1434_vm2, %v1432_v1 }
 0xd13   :  { %1357 = vmatprep.subr.bf16.mxu0 %v1432_v1 }
 0xd16   :  { %1358 = vmatpush3.bf16.msra.mxu0 %v1590_v59 }
 0xd17   :  { %1371 = vmatprep.subr.bf16.mxu0 %v1432_v1 }
 0xde4   :  { %v885_v24 = vpop.f32.mrb[24].mxu0 }
 0xde5   :  { %v886_v26 = vadd.f32 %v1610_v5, %v885_v24  ;;  %v1345_v27 = vpop.f32.mrb[25].mxu0 }
 0xde6   :  { %v888_v28 = vpop.f32.mrb[26].mxu0 }
 0xde7   :  { %906 = vperm.xlu0 %1413, %v886_v26   ;;  %900 = vperm.xlu1 %1412, %v886_v26   ;;  %v1346_v29 = vpop.f32.mrb[27].mxu0  ;;  %v893_v30 = vsub.f32 %v886_v26, %v1188_v25 }
 0xde9   :  { %v894_v31 = vmul.f32 %v893_v30, %v893_v30 }
 0xdeb   :  { %1414 = vset.pattern.permute.xlu1 %v1436_v11  ;;  %1416 = vset.pattern.permute.xlu0 %v1435_v10  ;;  %v895_v32 = vmul.f32 0.95099, %v894_v31 }
 0xdec   :  { %912 = vperm.xlu1 %1414, %v886_v26  }
 0xded   :  { %v896_v33 = vadd.f32 %v895_v32, %v774_v54 }
 0xdf0   :  { %1415 = vset.pattern.permute.xlu1 %v1438_v14 }
 0xdf1   :  { %918 = vperm.xlu1 %1415, %v886_v26  }
 0xdf5   :  { %1417 = vset.pattern.permute.xlu1 %v1437_v13 }
 0xe66   :  { %v901_v34 = vpop.permute.xlu1 %900  ;;  %v907_v36 = vpop.permute.xlu0 %906 }
 0xe67   :  { %v903_v35 = vmul.f32 %v901_v34, %v1565_v38  ;;  %v909_v41 = vmul.f32 %v907_v36, %v1567_v40 }
 0xe69   :  { %v904_v39 = vadd.f32 %v903_v35, %v897_v37 }
 0xe6b   :  { %v913_v42 = vpop.permute.xlu1 %912  ;;  %v910_v43 = vadd.f32 %v909_v41, %v904_v39 }
 0xe6c   :  { %v915_v10 = vmul.f32 %v913_v42, %v1570_v44 }
 0xe6e   :  { %v916_v47 = vadd.f32 %v915_v10, %v910_v43 }
 0xe70   :  { %v919_v45 = vpop.permute.xlu1 %918 }
 0xe71   :  { %v921_v48 = vmul.f32 %v919_v45, %v1573_v46 }
 0xe73   :  { %v922_v49 = vadd.f32 %v921_v48, %v916_v47 }
 0xe75   :  { %v923_v50 = vmax.f32 %v922_v49, 0.0 }
 0xe77   :  { %v924_v51 = vpack.c.bf16 %v923_v50, %v923_v50 }
 0xe79   :  { %1352 = vmatmul.mubr.msk.bf16.vlgmr.msra.gmra.mrb[24].mxu1 %vm188_vm8, %v924_v51 }
 0xe7a   :  { %1364 = vmatpush3.bf16.msra.mxu1 %v1527_v17  ;;  %1367 = vmatprep.mubr.msk.bf16.mxu1 %vm1434_vm2, %v1432_v1 }
 0xe7b   :  { %1365 = vmatprep.subr.bf16.mxu1 %v1432_v1 }
 0xe7e   :  { %1366 = vmatpush3.bf16.msra.mxu1 %v1537_v20  ;;  %v1191_v20 = vld [vmem:[%s1803_s2 + $0xc] sm:$0x3] }
 0xf4c   :  { %v962_v13 = vpop.f32.mrb[24].mxu1 }
 0xf4d   :  { %v963_v52 = vadd.f32 %v1597_v60, %v962_v13  ;;  %v1353_v53 = vpop.f32.mrb[25].mxu1 }
 0xf4e   :  { %v965_v54 = vpop.f32.mrb[26].mxu1 }
 0xf4f   :  { %v968_v55 = vmax.f32 %v963_v52, 0.0  ;;  %v1354_v56 = vpop.f32.mrb[27].mxu1 }
 0xf51   :  { %v969_v57 = vpack.c.bf16 %v968_v55, %v968_v55 }
 0xf53   :  { %1360 = vmatmul.mubr.msk.bf16.vlgmr.msra.gmra.mrb[28].mxu0 %vm188_vm8, %v969_v57 }
 0xf54   :  { %1372 = vmatpush3.bf16.msra.mxu0 %v1547_v23  ;;  %1375 = vmatprep.mubr.msk.bf16.mxu0 %vm1434_vm2, %v1432_v1 }
 0xf55   :  { %1373 = vmatprep.subr.bf16.mxu0 %v1432_v1 }
 0xf58   :  { %1374 = vmatpush3.bf16.msra.mxu0 %v1590_v59 }
0x1026   :  { %v1007_v17 = vpop.f32.mrb[28].mxu0 }
0x1027   :  { %v1008_v58 = vadd.f32 %v1610_v5, %v1007_v17  ;;  %v1361_v61 = vpop.f32.mrb[29].mxu0 }
0x1028   :  { %v1010_v62 = vpop.f32.mrb[30].mxu0 }
0x1029   :  { %1028 = vperm.xlu1 %1417, %v1008_v58   ;;  %1022 = vperm.xlu0 %1416, %v1008_v58   ;;  %v1362_v63 = vpop.f32.mrb[31].mxu0  ;;  %v1015_v23 = vsub.f32 %v1008_v58, %v1191_v20 }
0x102b   :  { %v1016_v0 = vmul.f32 %v1015_v23, %v1015_v23 }
0x102d   :  { %1418 = vset.pattern.permute.xlu1 %v1436_v11  ;;  %1419 = vset.pattern.permute.xlu0 %v1438_v14  ;;  %v1017_v1 = vmul.f32 0.94148016, %v1016_v0 }
0x102e   :  { %1034 = vperm.xlu1 %1418, %v1008_v58   ;;  %1040 = vperm.xlu0 %1419, %v1008_v58  }
0x102f   :  { %v1018_v59 = vadd.f32 %v1017_v1, %v896_v33 }
0x10a8   :  { %v1029_v2 = vpop.permute.xlu1 %1028  ;;  %v1023_v3 = vpop.permute.xlu0 %1022 }
0x10a9   :  { %v1025_v4 = vmul.f32 %v1023_v3, %v1565_v38  ;;  %v1031_v7 = vmul.f32 %v1029_v2, %v1567_v40 }
0x10ab   :  { %v1026_v8 = vadd.f32 %v1025_v4, %v1019_v6 }
0x10ad   :  { %v1035_v9 = vpop.permute.xlu1 %1034  ;;  %v1032_v12 = vadd.f32 %v1031_v7, %v1026_v8  ;;  %v1041_v15 = vpop.permute.xlu0 %1040 }
0x10ae   :  { %v1037_v16 = vmul.f32 %v1035_v9, %v1570_v44  ;;  %v1043_v14 = vmul.f32 %v1041_v15, %v1573_v46  ;;  %v1194_v44 = vld [vmem:[%s1803_s2 + $0xe] sm:$0x3] }
0x10b0   :  { %v1038_v11 = vadd.f32 %v1037_v16, %v1032_v12 }
0x10b2   :  { %v1044_v18 = vadd.f32 %v1043_v14, %v1038_v11 }
0x10b4   :  { %v1045_v19 = vmax.f32 %v1044_v18, 0.0 }
0x10b6   :  { %v1046_v21 = vpack.c.bf16 %v1045_v19, %v1045_v19 }
0x10b8   :  { %1368 = vmatmul.mubr.msk.bf16.vlgmr.msra.gmra.mrb[28].mxu1 %vm188_vm8, %v1046_v21 }
0x118b   :  { %v1084_v22 = vpop.f32.mrb[28].mxu1 }
0x118c   :  { %v1085_v38 = vadd.f32 %v1597_v60, %v1084_v22  ;;  %v1369_v24 = vpop.f32.mrb[29].mxu1 }
0x118d   :  { %v1087_v25 = vpop.f32.mrb[30].mxu1 }
0x118e   :  { %v1090_v40 = vmax.f32 %v1085_v38, 0.0  ;;  %v1370_v26 = vpop.f32.mrb[31].mxu1 }
0x1190   :  { %v1091_v27 = vpack.c.bf16 %v1090_v40, %v1090_v40 }
0x1192   :  { %1376 = vmatmul.mubr.msk.bf16.vlgmr.msra.gmra.mrb[32].mxu0 %vm188_vm8, %v1091_v27 }
0x1265   :  { %v1129_v28 = vpop.f32.mrb[32].mxu0 }
0x1266   :  { %v1130_v46 = vadd.f32 %v1610_v5, %v1129_v28  ;;  %v1377_v29 = vpop.f32.mrb[33].mxu0 }
0x1267   :  { %v1132_v30 = vpop.f32.mrb[34].mxu0 }
0x1268   :  { %v1137_v31 = vsub.f32 %v1130_v46, %v1194_v44  ;;  %v1378_v32 = vpop.f32.mrb[35].mxu0 }
0x126a   :  { %v1138_v33 = vmul.f32 %v1137_v31, %v1137_v31 }
0x126c   :  { %v1139_v60 = vmul.f32 0.93206537, %v1138_v33 }
0x126e   :  { %v1140_v34 = vadd.f32 %v1139_v60, %v1018_v59 }
0x1270   :  { %v1142_v35 = vsel %vm1141_vm9, %v1140_v34, 0.0 }
0x1271   :  { %1143 = vadd.xlane.f32.xlu1 %v1142_v35 }
0x12fe   :  { %v1144_v36 = vpop.xlane.xlu1 %1143 }
0x12ff   :  { %v1145_v37 = vrot.slane %v1144_v36, 4 }
0x1301   :  { %v1146_v39 = vadd.f32 %v1145_v37, %v1144_v36 }
0x1303   :  { %v1147_v41 = vrot.slane %v1146_v39, 2 }
0x1305   :  { %v1148_v42 = vadd.f32 %v1147_v41, %v1146_v39 }
0x1307   :  { %v1149_v43 = vrot.slane %v1148_v42, 1 }
0x1309   :  { %v1150_v10 = vadd.f32 %v1149_v43, %v1148_v42 }
0x130b   :  { %1379 = vpush %v1150_v10 }
0x133c   :  { %s1380_s2 = spop %1379 }
0x133d   :  { %s1152_s29 = smul.f32 0.125, %s1380_s2 }
0x133f   :  { %1154 = sst [smem:[#allocation3]] %s1152_s29 }
0x1340   :  { %1429 = shalt.err (!%p1426_p2)
}
0x1341   :  { %s1439_s14 = smov [#allocation3]  }
0x1342   :  { %1162 = dma.smem_to_hbm %s1439_s14, 16, %s1811_s10, [#allocation4]  }
0x1343   :  { %1430 = dma.done.wait [#allocation4], 16  }
0x1344   :  { %1431 = vsyncadd [#allocation4], 4294967280 }
0x1345   :  { %1166 = sfence }
0x1346   :  { %1167 = vsyncpa [#allocation4], 1 }

</bundles_post_ra>
